<compile_context>
chip_gen: v7x
topology: tpu7x:2x2x1
jax: 0.10.0
libtpu: 0.0.40
codegen_flags: <defaults>
</compile_context>

<pallas_src>
import numpy as np
import jax
import jax.numpy as jnp
from jax import lax
from jax.experimental import pallas as pl
from jax.experimental.pallas import tpu as pltpu

HEADS = 4
DIM_HEAD = 32
F32 = jnp.float32
BF16 = jnp.bfloat16
VMEM_LIMIT = 32 * 1024 * 1024  # safe on v5e/v6e/v7x, far above actual usage


# ---------------------------------------------------------------------------
# Host-side helpers (pure data prep, no compute)
# ---------------------------------------------------------------------------
def _pad_flat(x):
    """(B,H,W,C) -> (B, (H+2)*(W+2)+2, C): zero-pad spatially, flatten rows,
    add one extra zero row front/back so every 3x3 tap is a contiguous
    row-slice at offset dy*(W+2)+dx."""
    B, H, W, C = x.shape
    xp = jnp.pad(x, ((0, 0), (1, 1), (1, 1), (0, 0)))
    xpf = xp.reshape(B, (H + 2) * (W + 2), C)
    z = jnp.zeros((B, 1, C), x.dtype)
    return jnp.concatenate([z, xpf, z], axis=1)


def _valid_mask(H, W):
    """(H*(W+2), 1) mask: 1.0 on true pixels, 0.0 on the two pad columns."""
    Wp = W + 2
    col = np.arange(H * Wp) % Wp
    m = ((col >= 1) & (col <= W)).astype(np.float32)
    return jnp.asarray(m.reshape(H * Wp, 1))


def _group_map(C, G):
    gmap = np.kron(np.eye(G), np.ones((C // G, 1))).astype(np.float32)  # (C, G)
    return jnp.asarray(gmap), jnp.asarray(gmap.T)


def _tap_offsets(W):
    Wp = W + 2
    return tuple(dy * Wp + dx for dy in range(3) for dx in range(3))


# ---------------------------------------------------------------------------
# In-kernel helpers
# ---------------------------------------------------------------------------
def _group_norm(h, gamma, beta, gmap, gmapT, nvalid, eps, mask=None, silu=False):
    """GroupNorm over rows of h:(N,C) (rows with mask==0 excluded from the
    statistics), centered two-pass variance in fp32, optional fused SiLU.
    gmap=None means a single group (PreNorm).  The tiny (1,C)x(C,G) reduce /
    broadcast matmuls are kept: with GN fused into the conv kernel they are
    negligible next to the conv matmuls."""
    hm = h if mask is None else h * mask
    s = jnp.sum(hm, axis=0, keepdims=True)                          # (1, C)
    if gmap is None:
        mean_c = jnp.sum(s, axis=1, keepdims=True) / nvalid         # (1, 1)
    else:
        mean_c = jnp.dot(jnp.dot(s, gmap, preferred_element_type=F32) / nvalid,
                         gmapT, preferred_element_type=F32)         # (1, C)
    d = h - mean_c
    if mask is not None:
        d = d * mask
    ss = jnp.sum(d * d, axis=0, keepdims=True)                      # (1, C)
    if gmap is None:
        inv_c = lax.rsqrt(jnp.sum(ss, axis=1, keepdims=True) / nvalid + eps)
    else:
        var_g = jnp.dot(ss, gmap, preferred_element_type=F32) / nvalid
        inv_c = jnp.dot(lax.rsqrt(var_g + eps), gmapT, preferred_element_type=F32)
    y = d * inv_c * gamma + beta
    return y * jax.nn.sigmoid(y) if silu else y


# ---------------------------------------------------------------------------
# Fused ResnetBlock kernel
# ---------------------------------------------------------------------------
def resnet_block(x, p, groups):
    """conv3x3 -> GN -> SiLU -> conv3x3 -> GN -> SiLU -> (+residual) in one
    pallas_call per batch element."""
    B, H, W, Cin = x.shape
    Cout = p['b1'].shape[-1]
    G = groups
    Wp = W + 2
    HWw = H * Wp
    Lin = (H + 2) * Wp + 2
    offs = _tap_offsets(W)
    nvalid = float(H * W * (Cout // G))
    has_res = 'res_w' in p
    mask = _valid_mask(H, W)
    xpf = _pad_flat(x)

    def kernel(*args):
        if has_res:
            (x_ref, m_ref, w1_ref, b1_ref, g1_ref, be1_ref,
             w2_ref, b2_ref, g2_ref, be2_ref, gm_ref, gmt_ref,
             rw_ref, rb_ref, o_ref, sh_ref) = args
        else:
            (x_ref, m_ref, w1_ref, b1_ref, g1_ref, be1_ref,
             w2_ref, b2_ref, g2_ref, be2_ref, gm_ref, gmt_ref,
             o_ref, sh_ref) = args
        m = m_ref[...]
        gm, gmt = gm_ref[...], gmt_ref[...]

        # ---- Block1: conv3x3 (9 resident row-slice taps) + GN + SiLU ----
        acc = jnp.zeros((HWw, Cout), F32)
        for t, off in enumerate(offs):
            tap = x_ref[0, pl.ds(off, HWw), :].astype(BF16)
            acc = acc + jnp.dot(tap, w1_ref[t], preferred_element_type=F32)
        h = _group_norm(acc + b1_ref[...], g1_ref[...], be1_ref[...],
                        gm, gmt, nvalid, 1e-5, mask=m, silu=True)

        # ---- re-pad h (zero borders) into the VMEM scratch for conv2 ----
        sh_ref[...] = jnp.zeros_like(sh_ref)
        sh_ref[pl.ds(Wp + 1, HWw), :] = h * m

        # ---- Block2: conv3x3 + GN + SiLU ----
        acc2 = jnp.zeros((HWw, Cout), F32)
        for t, off in enumerate(offs):
            tap = sh_ref[pl.ds(off, HWw), :].astype(BF16)
            acc2 = acc2 + jnp.dot(tap, w2_ref[t], preferred_element_type=F32)
        h2 = _group_norm(acc2 + b2_ref[...], g2_ref[...], be2_ref[...],
                         gm, gmt, nvalid, 1e-5, mask=m, silu=True)

        # ---- residual ----
        xv = x_ref[0, pl.ds(Wp + 1, HWw), :]        # x in the wide domain
        if has_res:
            res = jnp.dot(xv.astype(BF16), rw_ref[...],
                          preferred_element_type=F32) + rb_ref[...]
        else:
            res = xv
        o_ref[0] = h2 + res

    def full(*s):
        return pl.BlockSpec(s, lambda i, _s=s: (0,) * len(_s))

    in_specs = [
        pl.BlockSpec((1, Lin, Cin), lambda i: (i, 0, 0)),
        full(HWw, 1),
        full(9, Cin, Cout), full(1, Cout), full(1, Cout), full(1, Cout),
        full(9, Cout, Cout), full(1, Cout), full(1, Cout), full(1, Cout),
        full(Cout, G), full(G, Cout),
    ]
    inputs = [xpf, mask, p['w1'], p['b1'], p['g1'], p['be1'],
              p['w2'], p['b2'], p['g2'], p['be2'], p['gmap'], p['gmapT']]
    if has_res:
        in_specs += [full(Cin, Cout), full(1, Cout)]
        inputs += [p['res_w'], p['res_b']]

    out = pl.pallas_call(
        kernel,
        out_shape=jax.ShapeDtypeStruct((B, HWw, Cout), F32),
        grid=(B,),
        in_specs=in_specs,
        out_specs=pl.BlockSpec((1, HWw, Cout), lambda i: (i, 0, 0)),
        scratch_shapes=[pltpu.VMEM((Lin, Cout), F32)],
        compiler_params=pltpu.CompilerParams(
            dimension_semantics=("parallel",),
            vmem_limit_bytes=VMEM_LIMIT),
    )(*inputs)
    return out.reshape(B, H, Wp, Cout)[:, :, 1:W + 1, :]


# ---------------------------------------------------------------------------
# 3x3 conv kernel (optionally fused with a preceding GroupNorm + SiLU)
# ---------------------------------------------------------------------------
def conv3x3(x, w9, b, pre_gn=None):
    """3x3 conv, stride 1, pad 1.  x:(B,H,W,Cin)  w9:(9,Cin,Cout) bf16
    b:(1,Cout).  pre_gn (dict) fuses norm_out -> SiLU -> conv_out."""
    B, H, W, Cin = x.shape
    Cout = w9.shape[-1]
    Wp = W + 2
    HWw = H * Wp
    Lin = (H + 2) * Wp + 2
    offs = _tap_offsets(W)
    mask = _valid_mask(H, W)
    xpf = _pad_flat(x)

    if pre_gn is None:
        def kernel(x_ref, w_ref, b_ref, o_ref):
            acc = jnp.zeros((HWw, Cout), F32)
            for t, off in enumerate(offs):
                tap = x_ref[0, pl.ds(off, HWw), :].astype(BF16)
                acc = acc + jnp.dot(tap, w_ref[t], preferred_element_type=F32)
            o_ref[0] = acc + b_ref[...]

        in_specs = [pl.BlockSpec((1, Lin, Cin), lambda i: (i, 0, 0)),
                    pl.BlockSpec((9, Cin, Cout), lambda i: (0, 0, 0)),
                    pl.BlockSpec((1, Cout), lambda i: (0, 0))]
        inputs = (xpf, w9, b)
        scratch = []
    else:
        G, eps = pre_gn['groups'], pre_gn['eps']
        nvalid = float(H * W * (Cin // G))

        def kernel(x_ref, m_ref, g_ref, be_ref, gm_ref, gmt_ref,
                   w_ref, b_ref, o_ref, sh_ref):
            m = m_ref[...]
            xv = x_ref[0, pl.ds(Wp + 1, HWw), :]
            h = _group_norm(xv, g_ref[...], be_ref[...], gm_ref[...], gmt_ref[...],
                            nvalid, eps, mask=m, silu=True)
            sh_ref[...] = jnp.zeros_like(sh_ref)
            sh_ref[pl.ds(Wp + 1, HWw), :] = h * m
            acc = jnp.zeros((HWw, Cout), F32)
            for t, off in enumerate(offs):
                tap = sh_ref[pl.ds(off, HWw), :].astype(BF16)
                acc = acc + jnp.dot(tap, w_ref[t], preferred_element_type=F32)
            o_ref[0] = acc + b_ref[...]

        in_specs = [pl.BlockSpec((1, Lin, Cin), lambda i: (i, 0, 0)),
                    pl.BlockSpec((HWw, 1), lambda i: (0, 0)),
                    pl.BlockSpec((1, Cin), lambda i: (0, 0)),
                    pl.BlockSpec((1, Cin), lambda i: (0, 0)),
                    pl.BlockSpec((Cin, G), lambda i: (0, 0)),
                    pl.BlockSpec((G, Cin), lambda i: (0, 0)),
                    pl.BlockSpec((9, Cin, Cout), lambda i: (0, 0, 0)),
                    pl.BlockSpec((1, Cout), lambda i: (0, 0))]
        inputs = (xpf, mask, pre_gn['g'], pre_gn['be'],
                  pre_gn['gmap'], pre_gn['gmapT'], w9, b)
        scratch = [pltpu.VMEM((Lin, Cin), F32)]

    out = pl.pallas_call(
        kernel,
        out_shape=jax.ShapeDtypeStruct((B, HWw, Cout), F32),
        grid=(B,),
        in_specs=in_specs,
        out_specs=pl.BlockSpec((1, HWw, Cout), lambda i: (i, 0, 0)),
        scratch_shapes=scratch,
        compiler_params=pltpu.CompilerParams(
            dimension_semantics=("parallel",),
            vmem_limit_bytes=VMEM_LIMIT),
    )(*inputs)
    return out.reshape(B, H, Wp, Cout)[:, :, 1:W + 1, :]


# ---------------------------------------------------------------------------
# 1x1 conv kernel (Downsample projection)
# ---------------------------------------------------------------------------
def conv1x1(x, w, b):
    B, H, W, Cin = x.shape
    Cout = w.shape[-1]
    HW = H * W
    xf = x.reshape(B, HW, Cin)

    def kernel(x_ref, w_ref, b_ref, o_ref):
        o_ref[0] = jnp.dot(x_ref[0].astype(BF16), w_ref[...],
                           preferred_element_type=F32) + b_ref[...]

    out = pl.pallas_call(
        kernel,
        out_shape=jax.ShapeDtypeStruct((B, HW, Cout), F32),
        grid=(B,),
        in_specs=[pl.BlockSpec((1, HW, Cin), lambda i: (i, 0, 0)),
                  pl.BlockSpec((Cin, Cout), lambda i: (0, 0)),
                  pl.BlockSpec((1, Cout), lambda i: (0, 0))],
        out_specs=pl.BlockSpec((1, HW, Cout), lambda i: (i, 0, 0)),
        compiler_params=pltpu.CompilerParams(
            dimension_semantics=("parallel",),
            vmem_limit_bytes=VMEM_LIMIT),
    )(xf, w, b)
    return out.reshape(B, H, W, Cout)


def downsample(x, p):
    # pixel-unshuffle (2x2) + 1x1 conv (4*dim -> dim); rearrange is pure glue.
    B, H, W, C = x.shape
    xr = x.reshape(B, H // 2, 2, W // 2, 2, C)
    xr = xr.transpose(0, 1, 3, 5, 2, 4).reshape(B, H // 2, W // 2, 4 * C)
    return conv1x1(xr, p['w'], p['b'])


# ---------------------------------------------------------------------------
# Fused attention block: Residual(PreNorm(GroupNorm(1,C)) -> Attention -> proj)
# ---------------------------------------------------------------------------
def attn_block(x, p):
    B, H, W, C = x.shape
    n = H * W
    scale = DIM_HEAD ** -0.5
    xf = x.reshape(B, n, C)
    nvalid = float(n * C)

    def kernel(x_ref, g_ref, be_ref, qw_ref, kw_ref, vw_ref, ow_ref, ob_ref, o_ref):
        xv = x_ref[0]                                              # (n, C) f32
        xn = _group_norm(xv, g_ref[...], be_ref[...], None, None,
                         nvalid, 1e-5, mask=None, silu=False)
        xnb = xn.astype(BF16)
        acc = jnp.zeros((n, C), F32)
        for h in range(HEADS):
            q = jnp.dot(xnb, qw_ref[h], preferred_element_type=F32) * scale
            k = jnp.dot(xnb, kw_ref[h], preferred_element_type=F32)
            v = jnp.dot(xnb, vw_ref[h], preferred_element_type=F32)
            sim = lax.dot_general(q.astype(BF16), k.astype(BF16),
                                  (((1,), (1,)), ((), ())),
                                  preferred_element_type=F32)      # (n, n)
            sim = sim - jnp.max(sim, axis=-1, keepdims=True)
            pexp = jnp.exp(sim)
            attn = pexp * pl.reciprocal(jnp.sum(pexp, axis=-1, keepdims=True),
                                        approx=True)
            oh = jnp.dot(attn.astype(BF16), v.astype(BF16),
                         preferred_element_type=F32)               # (n, d)
            acc = acc + jnp.dot(oh.astype(BF16), ow_ref[h],
                                preferred_element_type=F32)
        o_ref[0] = acc + ob_ref[...] + xv

    out = pl.pallas_call(
        kernel,
        out_shape=jax.ShapeDtypeStruct((B, n, C), F32),
        grid=(B,),
        in_specs=[pl.BlockSpec((1, n, C), lambda i: (i, 0, 0)),
                  pl.BlockSpec((1, C), lambda i: (0, 0)),
                  pl.BlockSpec((1, C), lambda i: (0, 0)),
                  pl.BlockSpec((HEADS, C, DIM_HEAD), lambda i: (0, 0, 0)),
                  pl.BlockSpec((HEADS, C, DIM_HEAD), lambda i: (0, 0, 0)),
                  pl.BlockSpec((HEADS, C, DIM_HEAD), lambda i: (0, 0, 0)),
                  pl.BlockSpec((HEADS, DIM_HEAD, C), lambda i: (0, 0, 0)),
                  pl.BlockSpec((1, C), lambda i: (0, 0))],
        out_specs=pl.BlockSpec((1, n, C), lambda i: (i, 0, 0)),
        compiler_params=pltpu.CompilerParams(
            dimension_semantics=("parallel",),
            vmem_limit_bytes=VMEM_LIMIT),
    )(xf, p['n_g'], p['n_be'], p['qw'], p['kw'], p['vw'], p['ow'], p['ob'])
    return out.reshape(B, H, W, C)


# ---------------------------------------------------------------------------
# Encoder forward
# ---------------------------------------------------------------------------
def stable_encoder(x_nchw, P, cfg):
    x = jnp.transpose(x_nchw, (0, 2, 3, 1)).astype(F32)            # NCHW -> NHWC
    groups = cfg['resnet_block_groups']
    num_res = len(cfg['dim_mult'])

    h = conv3x3(x, P['conv_in']['w'], P['conv_in']['b'])
    for i_level in range(num_res):
        for blk in P['down'][i_level]['blocks']:
            h = resnet_block(h, blk, groups)
            # attn_resolutions=() -> no in-level LinearAttention
        if i_level != num_res - 1:
            h = downsample(h, P['down'][i_level]['downsample'])

    h = resnet_block(h, P['mid_block1'], groups)
    h = attn_block(h, P['mid_attn'])
    h = resnet_block(h, P['mid_block2'], groups)

    # norm_out (eps=1e-6, matching the reference Normalize) + SiLU + conv_out
    h = conv3x3(h, P['conv_out']['w'], P['conv_out']['b'], pre_gn=P['norm_out'])
    return jnp.transpose(h, (0, 3, 1, 2))                          # NHWC -> NCHW


# ---------------------------------------------------------------------------
# Deterministic parameter initialisation (weights pre-cast / pre-reshaped once)
# ---------------------------------------------------------------------------
def _conv3x3_init(key, cin, cout):
    k1, k2 = jax.random.split(key)
    w = jax.random.normal(k1, (3, 3, cin, cout), F32) / np.sqrt(9 * cin)
    b = 0.01 * jax.random.normal(k2, (cout,), F32)
    return w.reshape(9, cin, cout).astype(BF16), b.reshape(1, cout)


def _conv1x1_init(key, cin, cout, bias=True):
    k1, k2 = jax.random.split(key)
    w = jax.random.normal(k1, (cin, cout), F32) / np.sqrt(cin)
    b = 0.01 * jax.random.normal(k2, (cout,), F32).reshape(1, cout) if bias else None
    return w, b


def _resblock_init(key, cin, cout, groups):
    ks = jax.random.split(key, 3)
    p = {}
    p['w1'], p['b1'] = _conv3x3_init(ks[0], cin, cout)
    p['g1'] = jnp.ones((1, cout), F32)
    p['be1'] = jnp.zeros((1, cout), F32)
    p['w2'], p['b2'] = _conv3x3_init(ks[1], cout, cout)
    p['g2'] = jnp.ones((1, cout), F32)
    p['be2'] = jnp.zeros((1, cout), F32)
    p['gmap'], p['gmapT'] = _group_map(cout, groups)
    if cin != cout:
        rw, rb = _conv1x1_init(ks[2], cin, cout)
        p['res_w'], p['res_b'] = rw.astype(BF16), rb
    return p


def _attn_init(key, dim):
    ks = jax.random.split(key, 2)
    hidden = HEADS * DIM_HEAD
    qkv_w, _ = _conv1x1_init(ks[0], dim, 3 * hidden, bias=False)   # to_qkv: no bias
    qw, kw, vw = jnp.split(qkv_w, 3, axis=1)                       # each (dim, hidden)

    def per_head(w):   # (dim, heads*d) -> (heads, dim, d)
        return w.reshape(dim, HEADS, DIM_HEAD).transpose(1, 0, 2).astype(BF16)

    out_w, out_b = _conv1x1_init(ks[1], hidden, dim)
    ow = out_w.reshape(HEADS, DIM_HEAD, dim).astype(BF16)
    return {'n_g': jnp.ones((1, dim), F32), 'n_be': jnp.zeros((1, dim), F32),
            'qw': per_head(qw), 'kw': per_head(kw), 'vw': per_head(vw),
            'ow': ow, 'ob': out_b}


def init_params(key, cfg):
    keys = iter(jax.random.split(key, 64))
    P = {}
    ch = cfg['init_dim']
    dim_mult = tuple(cfg['dim_mult'])
    in_ch_mult = (1,) + dim_mult
    groups = cfg['resnet_block_groups']

    w, b = _conv3x3_init(next(keys), cfg['channels'], ch)
    P['conv_in'] = {'w': w, 'b': b}
    P['down'] = []
    block_in = ch
    for i_level in range(len(dim_mult)):
        block_in = ch * in_ch_mult[i_level]
        block_out = ch * dim_mult[i_level]
        lvl = {'blocks': []}
        for _ in range(cfg['num_res_blocks']):
            lvl['blocks'].append(_resblock_init(next(keys), block_in, block_out, groups))
            block_in = block_out
        if i_level != len(dim_mult) - 1:
            dw, db = _conv1x1_init(next(keys), 4 * block_in, block_in)
            lvl['downsample'] = {'w': dw.astype(BF16), 'b': db}
        P['down'].append(lvl)

    P['mid_block1'] = _resblock_init(next(keys), block_in, block_in, groups)
    P['mid_attn'] = _attn_init(next(keys), block_in)
    P['mid_block2'] = _resblock_init(next(keys), block_in, block_in, groups)

    gm, gmt = _group_map(block_in, 32)
    P['norm_out'] = {'groups': 32, 'eps': 1e-6,
                     'g': jnp.ones((1, block_in), F32),
                     'be': jnp.zeros((1, block_in), F32),
                     'gmap': gm, 'gmapT': gmt}
    zc = 2 * cfg['z_channels'] if cfg['double_z'] else cfg['z_channels']
    w, b = _conv3x3_init(next(keys), block_in, zc)
    P['conv_out'] = {'w': w, 'b': b}
    return P


# ---------------------------------------------------------------------------
if __name__ == "__main__":
    cfg = dict(init_dim=32, out_ch=3, dim_mult=(1, 2), resnet_block_groups=8,
               attn_resolutions=(), channels=3, img_size=16, z_channels=4,
               double_z=True, num_res_blocks=1)

    key = jax.random.PRNGKey(0)
    kp, kx = jax.random.split(key)
    P = init_params(kp, cfg)

    x = jax.random.normal(kx, (2, cfg['channels'], cfg['img_size'], cfg['img_size']),
                          F32)

    y = stable_encoder(x, P, cfg)
    y = jax.block_until_ready(y)

    final_res = cfg['img_size'] // (2 ** (len(cfg['dim_mult']) - 1))
    expect = (2, 2 * cfg['z_channels'], final_res, final_res)
    assert y.shape == expect, (y.shape, expect)
    assert bool(jnp.all(jnp.isfinite(y)))
    print("KERNEL_OK")
</pallas_src>

<mosaic_0001>
module attributes {stable_mosaic.version = 11 : i64} {
  func.func @kernel(%arg0: i32, %arg1: memref<1x326x3xf32, #tpu.memory_space<vmem>>, %arg2: memref<9x3x32xbf16, #tpu.memory_space<vmem>>, %arg3: memref<1x32xf32, #tpu.memory_space<vmem>>, %arg4: memref<1x288x32xf32, #tpu.memory_space<vmem>>) attributes {dimension_semantics = [#tpu.dimension_semantics<parallel>], iteration_bounds = array<i64: 2>, scalar_prefetch = 0 : i64, scratch_operands = 0 : i64, tpu.core_type = #tpu.core_type<tc>, window_params = [{transform_indices = @transform_0, window_bounds = array<i64: 1, 326, 3>}, {pipeline_mode = #tpu.pipeline_mode<synchronous>, transform_indices = @transform_1, window_bounds = array<i64: 9, 3, 32>}, {pipeline_mode = #tpu.pipeline_mode<synchronous>, transform_indices = @transform_2, window_bounds = array<i64: 1, 32>}, {transform_indices = @transform_3, window_bounds = array<i64: 1, 288, 32>}]} {
    %cst = arith.constant 0.000000e+00 : f32
    %0 = vector.broadcast %cst : f32 to vector<288x32xf32>
    %c0 = arith.constant 0 : index
    %c0_0 = arith.constant 0 : index
    %c0_1 = arith.constant 0 : index
    %1 = vector.load %arg1[%c0, %c0_0, %c0_1] : memref<1x326x3xf32, #tpu.memory_space<vmem>>, vector<1x288x3xf32>
    %2 = vector.shape_cast %1 : vector<1x288x3xf32> to vector<288x3xf32>
    %3 = arith.truncf %2 : vector<288x3xf32> to vector<288x3xbf16>
    %c0_2 = arith.constant 0 : index
    %c0_3 = arith.constant 0 : index
    %c0_4 = arith.constant 0 : index
    %4 = vector.load %arg2[%c0_2, %c0_3, %c0_4] : memref<9x3x32xbf16, #tpu.memory_space<vmem>>, vector<1x3x32xbf16>
    %5 = vector.shape_cast %4 : vector<1x3x32xbf16> to vector<3x32xbf16>
    %cst_5 = arith.constant dense<0.000000e+00> : vector<288x32xf32>
    %6 = tpu.matmul %3, %5, %cst_5 {dimension_numbers = #tpu.dot_dimension_numbers<[1], [0], [0], [1], [0, 0, 1, 1], [], []>} : vector<288x3xbf16>, vector<3x32xbf16>, vector<288x32xf32> -> vector<288x32xf32>
    %7 = arith.addf %0, %6 : vector<288x32xf32>
    %c0_6 = arith.constant 0 : index
    %c1 = arith.constant 1 : index
    %c0_7 = arith.constant 0 : index
    %8 = vector.load %arg1[%c0_6, %c1, %c0_7] : memref<1x326x3xf32, #tpu.memory_space<vmem>>, vector<1x288x3xf32>
    %9 = vector.shape_cast %8 : vector<1x288x3xf32> to vector<288x3xf32>
    %10 = arith.truncf %9 : vector<288x3xf32> to vector<288x3xbf16>
    %c1_8 = arith.constant 1 : index
    %c0_9 = arith.constant 0 : index
    %c0_10 = arith.constant 0 : index
    %11 = vector.load %arg2[%c1_8, %c0_9, %c0_10] : memref<9x3x32xbf16, #tpu.memory_space<vmem>>, vector<1x3x32xbf16>
    %12 = vector.shape_cast %11 : vector<1x3x32xbf16> to vector<3x32xbf16>
    %cst_11 = arith.constant dense<0.000000e+00> : vector<288x32xf32>
    %13 = tpu.matmul %10, %12, %cst_11 {dimension_numbers = #tpu.dot_dimension_numbers<[1], [0], [0], [1], [0, 0, 1, 1], [], []>} : vector<288x3xbf16>, vector<3x32xbf16>, vector<288x32xf32> -> vector<288x32xf32>
    %14 = arith.addf %7, %13 : vector<288x32xf32>
    %c0_12 = arith.constant 0 : index
    %c2 = arith.constant 2 : index
    %c0_13 = arith.constant 0 : index
    %15 = vector.load %arg1[%c0_12, %c2, %c0_13] : memref<1x326x3xf32, #tpu.memory_space<vmem>>, vector<1x288x3xf32>
    %16 = vector.shape_cast %15 : vector<1x288x3xf32> to vector<288x3xf32>
    %17 = arith.truncf %16 : vector<288x3xf32> to vector<288x3xbf16>
    %c2_14 = arith.constant 2 : index
    %c0_15 = arith.constant 0 : index
    %c0_16 = arith.constant 0 : index
    %18 = vector.load %arg2[%c2_14, %c0_15, %c0_16] : memref<9x3x32xbf16, #tpu.memory_space<vmem>>, vector<1x3x32xbf16>
    %19 = vector.shape_cast %18 : vector<1x3x32xbf16> to vector<3x32xbf16>
    %cst_17 = arith.constant dense<0.000000e+00> : vector<288x32xf32>
    %20 = tpu.matmul %17, %19, %cst_17 {dimension_numbers = #tpu.dot_dimension_numbers<[1], [0], [0], [1], [0, 0, 1, 1], [], []>} : vector<288x3xbf16>, vector<3x32xbf16>, vector<288x32xf32> -> vector<288x32xf32>
    %21 = arith.addf %14, %20 : vector<288x32xf32>
    %c0_18 = arith.constant 0 : index
    %c18 = arith.constant 18 : index
    %c0_19 = arith.constant 0 : index
    %22 = vector.load %arg1[%c0_18, %c18, %c0_19] : memref<1x326x3xf32, #tpu.memory_space<vmem>>, vector<1x288x3xf32>
    %23 = vector.shape_cast %22 : vector<1x288x3xf32> to vector<288x3xf32>
    %24 = arith.truncf %23 : vector<288x3xf32> to vector<288x3xbf16>
    %c3 = arith.constant 3 : index
    %c0_20 = arith.constant 0 : index
    %c0_21 = arith.constant 0 : index
    %25 = vector.load %arg2[%c3, %c0_20, %c0_21] : memref<9x3x32xbf16, #tpu.memory_space<vmem>>, vector<1x3x32xbf16>
    %26 = vector.shape_cast %25 : vector<1x3x32xbf16> to vector<3x32xbf16>
    %cst_22 = arith.constant dense<0.000000e+00> : vector<288x32xf32>
    %27 = tpu.matmul %24, %26, %cst_22 {dimension_numbers = #tpu.dot_dimension_numbers<[1], [0], [0], [1], [0, 0, 1, 1], [], []>} : vector<288x3xbf16>, vector<3x32xbf16>, vector<288x32xf32> -> vector<288x32xf32>
    %28 = arith.addf %21, %27 : vector<288x32xf32>
    %c0_23 = arith.constant 0 : index
    %c19 = arith.constant 19 : index
    %c0_24 = arith.constant 0 : index
    %29 = vector.load %arg1[%c0_23, %c19, %c0_24] : memref<1x326x3xf32, #tpu.memory_space<vmem>>, vector<1x288x3xf32>
    %30 = vector.shape_cast %29 : vector<1x288x3xf32> to vector<288x3xf32>
    %31 = arith.truncf %30 : vector<288x3xf32> to vector<288x3xbf16>
    %c4 = arith.constant 4 : index
    %c0_25 = arith.constant 0 : index
    %c0_26 = arith.constant 0 : index
    %32 = vector.load %arg2[%c4, %c0_25, %c0_26] : memref<9x3x32xbf16, #tpu.memory_space<vmem>>, vector<1x3x32xbf16>
    %33 = vector.shape_cast %32 : vector<1x3x32xbf16> to vector<3x32xbf16>
    %cst_27 = arith.constant dense<0.000000e+00> : vector<288x32xf32>
    %34 = tpu.matmul %31, %33, %cst_27 {dimension_numbers = #tpu.dot_dimension_numbers<[1], [0], [0], [1], [0, 0, 1, 1], [], []>} : vector<288x3xbf16>, vector<3x32xbf16>, vector<288x32xf32> -> vector<288x32xf32>
    %35 = arith.addf %28, %34 : vector<288x32xf32>
    %c0_28 = arith.constant 0 : index
    %c20 = arith.constant 20 : index
    %c0_29 = arith.constant 0 : index
    %36 = vector.load %arg1[%c0_28, %c20, %c0_29] : memref<1x326x3xf32, #tpu.memory_space<vmem>>, vector<1x288x3xf32>
    %37 = vector.shape_cast %36 : vector<1x288x3xf32> to vector<288x3xf32>
    %38 = arith.truncf %37 : vector<288x3xf32> to vector<288x3xbf16>
    %c5 = arith.constant 5 : index
    %c0_30 = arith.constant 0 : index
    %c0_31 = arith.constant 0 : index
    %39 = vector.load %arg2[%c5, %c0_30, %c0_31] : memref<9x3x32xbf16, #tpu.memory_space<vmem>>, vector<1x3x32xbf16>
    %40 = vector.shape_cast %39 : vector<1x3x32xbf16> to vector<3x32xbf16>
    %cst_32 = arith.constant dense<0.000000e+00> : vector<288x32xf32>
    %41 = tpu.matmul %38, %40, %cst_32 {dimension_numbers = #tpu.dot_dimension_numbers<[1], [0], [0], [1], [0, 0, 1, 1], [], []>} : vector<288x3xbf16>, vector<3x32xbf16>, vector<288x32xf32> -> vector<288x32xf32>
    %42 = arith.addf %35, %41 : vector<288x32xf32>
    %c0_33 = arith.constant 0 : index
    %c36 = arith.constant 36 : index
    %c0_34 = arith.constant 0 : index
    %43 = vector.load %arg1[%c0_33, %c36, %c0_34] : memref<1x326x3xf32, #tpu.memory_space<vmem>>, vector<1x288x3xf32>
    %44 = vector.shape_cast %43 : vector<1x288x3xf32> to vector<288x3xf32>
    %45 = arith.truncf %44 : vector<288x3xf32> to vector<288x3xbf16>
    %c6 = arith.constant 6 : index
    %c0_35 = arith.constant 0 : index
    %c0_36 = arith.constant 0 : index
    %46 = vector.load %arg2[%c6, %c0_35, %c0_36] : memref<9x3x32xbf16, #tpu.memory_space<vmem>>, vector<1x3x32xbf16>
    %47 = vector.shape_cast %46 : vector<1x3x32xbf16> to vector<3x32xbf16>
    %cst_37 = arith.constant dense<0.000000e+00> : vector<288x32xf32>
    %48 = tpu.matmul %45, %47, %cst_37 {dimension_numbers = #tpu.dot_dimension_numbers<[1], [0], [0], [1], [0, 0, 1, 1], [], []>} : vector<288x3xbf16>, vector<3x32xbf16>, vector<288x32xf32> -> vector<288x32xf32>
    %49 = arith.addf %42, %48 : vector<288x32xf32>
    %c0_38 = arith.constant 0 : index
    %c37 = arith.constant 37 : index
    %c0_39 = arith.constant 0 : index
    %50 = vector.load %arg1[%c0_38, %c37, %c0_39] : memref<1x326x3xf32, #tpu.memory_space<vmem>>, vector<1x288x3xf32>
    %51 = vector.shape_cast %50 : vector<1x288x3xf32> to vector<288x3xf32>
    %52 = arith.truncf %51 : vector<288x3xf32> to vector<288x3xbf16>
    %c7 = arith.constant 7 : index
    %c0_40 = arith.constant 0 : index
    %c0_41 = arith.constant 0 : index
    %53 = vector.load %arg2[%c7, %c0_40, %c0_41] : memref<9x3x32xbf16, #tpu.memory_space<vmem>>, vector<1x3x32xbf16>
    %54 = vector.shape_cast %53 : vector<1x3x32xbf16> to vector<3x32xbf16>
    %cst_42 = arith.constant dense<0.000000e+00> : vector<288x32xf32>
    %55 = tpu.matmul %52, %54, %cst_42 {dimension_numbers = #tpu.dot_dimension_numbers<[1], [0], [0], [1], [0, 0, 1, 1], [], []>} : vector<288x3xbf16>, vector<3x32xbf16>, vector<288x32xf32> -> vector<288x32xf32>
    %56 = arith.addf %49, %55 : vector<288x32xf32>
    %c0_43 = arith.constant 0 : index
    %c38 = arith.constant 38 : index
    %c0_44 = arith.constant 0 : index
    %57 = vector.load %arg1[%c0_43, %c38, %c0_44] : memref<1x326x3xf32, #tpu.memory_space<vmem>>, vector<1x288x3xf32>
    %58 = vector.shape_cast %57 : vector<1x288x3xf32> to vector<288x3xf32>
    %59 = arith.truncf %58 : vector<288x3xf32> to vector<288x3xbf16>
    %c8 = arith.constant 8 : index
    %c0_45 = arith.constant 0 : index
    %c0_46 = arith.constant 0 : index
    %60 = vector.load %arg2[%c8, %c0_45, %c0_46] : memref<9x3x32xbf16, #tpu.memory_space<vmem>>, vector<1x3x32xbf16>
    %61 = vector.shape_cast %60 : vector<1x3x32xbf16> to vector<3x32xbf16>
    %cst_47 = arith.constant dense<0.000000e+00> : vector<288x32xf32>
    %62 = tpu.matmul %59, %61, %cst_47 {dimension_numbers = #tpu.dot_dimension_numbers<[1], [0], [0], [1], [0, 0, 1, 1], [], []>} : vector<288x3xbf16>, vector<3x32xbf16>, vector<288x32xf32> -> vector<288x32xf32>
    %63 = arith.addf %56, %62 : vector<288x32xf32>
    %c0_48 = arith.constant 0 : index
    %c0_49 = arith.constant 0 : index
    %64 = vector.load %arg3[%c0_48, %c0_49] : memref<1x32xf32, #tpu.memory_space<vmem>>, vector<1x32xf32>
    %65 = vector.broadcast %64 : vector<1x32xf32> to vector<288x32xf32>
    %66 = arith.addf %63, %65 : vector<288x32xf32>
    %c0_50 = arith.constant 0 : index
    %c0_51 = arith.constant 0 : index
    %c0_52 = arith.constant 0 : index
    %67 = vector.load %arg4[%c0_50, %c0_51, %c0_52] : memref<1x288x32xf32, #tpu.memory_space<vmem>>, vector<1x288x32xf32>
    %68 = vector.shape_cast %67 : vector<1x288x32xf32> to vector<288x32xf32>
    %69 = vector.shape_cast %66 : vector<288x32xf32> to vector<1x288x32xf32>
    tpu.vector_store %arg4[%c0_50, %c0_51, %c0_52], %69 {strides = array<i32>} : memref<1x288x32xf32, #tpu.memory_space<vmem>>, vector<1x288x32xf32>,
    return
  }
  func.func @transform_0(%arg0: i32) -> (i32, i32, i32) {
    %c0_i32 = arith.constant 0 : i32
    %c0_i32_0 = arith.constant 0 : i32
    %c0_i32_1 = arith.constant 0 : i32
    return %arg0, %c0_i32, %c0_i32_0 : i32, i32, i32
  }
  func.func @transform_1(%arg0: i32) -> (i32, i32, i32) {
    %c0_i32 = arith.constant 0 : i32
    %c0_i32_0 = arith.constant 0 : i32
    %c0_i32_1 = arith.constant 0 : i32
    %c0_i32_2 = arith.constant 0 : i32
    return %c0_i32, %c0_i32_0, %c0_i32_1 : i32, i32, i32
  }
  func.func @transform_2(%arg0: i32) -> (i32, i32) {
    %c0_i32 = arith.constant 0 : i32
    %c0_i32_0 = arith.constant 0 : i32
    %c0_i32_1 = arith.constant 0 : i32
    return %c0_i32, %c0_i32_0 : i32, i32
  }
  func.func @transform_3(%arg0: i32) -> (i32, i32, i32) {
    %c0_i32 = arith.constant 0 : i32
    %c0_i32_0 = arith.constant 0 : i32
    %c0_i32_1 = arith.constant 0 : i32
    return %arg0, %c0_i32, %c0_i32_0 : i32, i32, i32
  }
}

</mosaic_0001>

<bundles_post_ra>
// kernel: tpu_custom_call.1
= control target key start
LH: loop header
LB: loop body
LE: loop exit
PB: predicated region body
PF: predicated region fallthrough
CT: control target
= control target key end

     0   :  { %s4196_s12 = smov 0   ;;  %s4970_s0 = inlined_call_operand.vmem [shape: f32[2,326,3], index: 0, kind: input, shape index: {}]   ;;  %s4971_s1 = inlined_call_operand.vmem [shape: bf16[9,3,32], index: 1, kind: input, shape index: {}]   ;;  %s4972_s2 = inlined_call_operand.vmem [shape: f32[1,32], index: 2, kind: input, shape index: {}]   ;;  %s4973_s3 = inlined_call_operand.vmem [shape: f32[2,288,32], index: 3, kind: output, shape index: {}]  }
   0x1 LB: > { %s3173_s13 = sadd.s32 4294967295, %s4173_s12   ;;  %p3177_p0 = scmp.ge.s32.totalorder %s4173_s12, 1  ;;  %s4173_s12 = sphi %s4196_s12, %s13_s12  }
   0x2   : > { %p137_p1 = scmp.lt.s32.totalorder %s4173_s12, 3 }
   0x4   : > { %p138_p2 = pnand %p3177_p0, %p137_p1 }
   0x5   : > { %vm338_vm0 = vcmask (!%p138_p2), 1040384   ;;  %vm339_vm1 = vcmask (!%p138_p2), 1041408   ;;  %v3255_v0 = vld [vmem:[%s4971_s1 + $0x8] sm:$0x3] (!%p138_p2)  ;;  %p161_p3 = scmp.lt.s32.totalorder (!%p138_p2), %s3173_s13, 1  ;;  %v4175_v1 = vmov (!%p138_p2), 65535  }
   0x6   : > { %141 = sbr.rel (%p138_p2) target bundleno = 562 (0x232), region = 32  ;;  %v340_v2 = vsel (!%p138_p2), %vm338_vm0, 4294967295, %v4175_v1  ;;  %v3180_v3 = vld [vmem:[%s4971_s1 + $0x2] sm:$0x3] (!%p138_p2)  ;;  %v3274_v4 = vld [vmem:[%s4971_s1 + $0xa] sm:$0x3] (!%p138_p2) }
   0x7   : > { %v4213_v5 = vsel (!%p138_p2), %vm339_vm1, %v340_v2, 0  ;;  %v226_v6 = vld [vmem:[%s4971_s1] sm:$0x3] (!%p138_p2)  ;;  %v3293_v11 = vld [vmem:[%s4971_s1 + $0xc] sm:$0x3] (!%p138_p2)  ;;  %vm283_vm2 = vcmask (!%p138_p2), 23552  }
   0x8   : > { %v4221_v7 = vand.u32 (!%p138_p2), %v3255_v0, %v4213_v5  ;;  %v343_v8 = vand.u32 (!%p138_p2), %v3180_v3, %v4213_v5  ;;  %v1845_v9 = vand.u32 (!%p138_p2), %v3274_v4, %v4213_v5  ;;  %v577_v10 = vand.u32 (!%p138_p2), %v4213_v5, %v226_v6  ;;  %v3217_v12 = vld [vmem:[%s4971_s1 + $0x4] sm:$0x3] (!%p138_p2) }
   0x9   : > { %v4254_v29 = vand.u32 (!%p138_p2), %v3293_v11, %v4213_v5  ;;  %v4259_v32 = vand.u32 (!%p138_p2), %v3217_v12, %v4213_v5  ;;  %vm3081_vm3 = vcmask (!%p138_p2), 261120  }
   0xa   : > { %3676 = vmatprep.subr.bf16.mxu0 (!%p138_p2), %v4221_v7  ;;  %3524 = vmatprep.subr.bf16.mxu1 (!%p138_p2), %v343_v8 }
   0xb   : > { %3677 = vmatpush3.bf16.msra.mxu0 (!%p138_p2), %v4221_v7  ;;  %3525 = vmatpush3.bf16.msra.mxu1 (!%p138_p2), %v343_v8 }
   0xc   : > { %3714 = vmatprep.subr.bf16.mxu0 (!%p138_p2), %v1845_v9  ;;  %3562 = vmatprep.subr.bf16.mxu1 (!%p138_p2), %v577_v10 }
   0xd   : > { %s4975_s13 = smov (!%p161_p3, %s3173_s13), 1 }
   0xe   : > { %s4156_s22 = smul.u32 328, %s4975_s13 }
   0xf   : > { %s4157_s9 = smul.u32 288, %s4975_s13 }
  0x10   : > { %s4232_s25 = scalar_lea.vmem %s4970_s0, %s4156_s22 }
  0x11   : > { %v227_v13 = vld [vmem:[%s4232_s25 + $0x1] sm:$0xff]  ;;  %v228_v14 = vld [vmem:[%s4232_s25 + $0x9] sm:$0xff]  ;;  %v1408_v15 = vld [vmem:[%s4232_s25 + $0x13] sm:$0xff]  ;;  %s4851_s16 = scalar_lea.vmem %s4973_s3, %s4157_s9 }
  0x12   : > { %v263_v16 = vpack.c.bf16 %v228_v14, %v227_v13  ;;  %v1409_v17 = vld [vmem:[%s4232_s25 + $0x1b] sm:$0xff]  ;;  %v229_v18 = vld [vmem:[%s4232_s25 + $0x11] sm:$0xff]  ;;  %v1410_v22 = vld [vmem:[%s4232_s25 + $0x23] sm:$0xff] }
  0x13   : > { %v230_v19 = vld [vmem:[%s4232_s25 + $0x19] sm:$0xff]  ;;  %v1444_v20 = vpack.c.bf16 %v1409_v17, %v1408_v15  ;;  %v1411_v23 = vld [vmem:[%s4232_s25 + $0x2b] sm:$0xff]  ;;  %v231_v24 = vld [vmem:[%s4232_s25 + $0x21] sm:$0xff] }
  0x14   : > { %v264_v21 = vpack.c.bf16 %v230_v19, %v229_v18  ;;  %3526 = vmatprep.mubr.msk.bf16.mxu1 %vm283_vm2, %v263_v16  ;;  %v1445_v25 = vpack.c.bf16 %v1411_v23, %v1410_v22  ;;  %v232_v26 = vld [vmem:[%s4232_s25 + $0x29] sm:$0xff]  ;;  %v1412_v27 = vld [vmem:[%s4232_s25 + $0x33] sm:$0xff]  ;;  %v1413_v28 = vld [vmem:[%s4232_s25 + $0x3b] sm:$0xff] }
  0x15   : > { %3678 = vmatprep.mubr.msk.bf16.mxu0 %vm283_vm2, %v1444_v20  ;;  %v265_v30 = vpack.c.bf16 %v232_v26, %v231_v24  ;;  %v1446_v31 = vpack.c.bf16 %v1413_v28, %v1412_v27  ;;  %v233_v33 = vld [vmem:[%s4232_s25 + $0x31] sm:$0xff]  ;;  %v234_v34 = vld [vmem:[%s4232_s25 + $0x39] sm:$0xff]  ;;  %v1414_v35 = vld [vmem:[%s4232_s25 + $0x43] sm:$0xff] }
  0x16   : > { %3527 = vmatmul.mubr.msk.bf16.vlgmr.msra.gmra.mrb[0].mxu1 %vm283_vm2, %v264_v21  ;;  %3679 = vmatmul.mubr.msk.bf16.vlgmr.msra.gmra.mrb[0].mxu0 %vm283_vm2, %v1445_v25  ;;  %v1415_v36 = vld [vmem:[%s4232_s25 + $0x4b] sm:$0xff]  ;;  %v235_v37 = vld [vmem:[%s4232_s25 + $0x41] sm:$0xff]  ;;  %v1416_v39 = vld [vmem:[%s4232_s25 + $0x53] sm:$0xff]  ;;  %v266_v41 = vpack.c.bf16 %v234_v34, %v233_v33 }
  0x17   : > { %3563 = vmatpush3.bf16.msra.mxu1 %v577_v10  ;;  %3715 = vmatpush3.bf16.msra.mxu0 %v1845_v9  ;;  %v236_v38 = vld [vmem:[%s4232_s25 + $0x49] sm:$0xff]  ;;  %v1417_v40 = vld [vmem:[%s4232_s25 + $0x5b] sm:$0xff]  ;;  %v1447_v42 = vpack.c.bf16 %v1415_v36, %v1414_v35  ;;  %v237_v45 = vld [vmem:[%s4232_s25 + $0x51] sm:$0xff] }
  0x18   : > { %3530 = vmatprep.mubr.msk.bf16.mxu1 %vm283_vm2, %v265_v30  ;;  %3682 = vmatprep.mubr.msk.bf16.mxu0 %vm283_vm2, %v1446_v31  ;;  %v267_v43 = vpack.c.bf16 %v236_v38, %v235_v37  ;;  %v1448_v44 = vpack.c.bf16 %v1417_v40, %v1416_v39  ;;  %v238_v46 = vld [vmem:[%s4232_s25 + $0x59] sm:$0xff]  ;;  %v1418_v47 = vld [vmem:[%s4232_s25 + $0x63] sm:$0xff]  ;;  %v1419_v48 = vld [vmem:[%s4232_s25 + $0x6b] sm:$0xff] }
  0x19   : > { %3752 = vmatprep.subr.bf16.mxu0 %v4254_v29  ;;  %3600 = vmatprep.subr.bf16.mxu1 %v4259_v32  ;;  %v239_v49 = vld [vmem:[%s4232_s25 + $0x61] sm:$0xff]  ;;  %v240_v50 = vld [vmem:[%s4232_s25 + $0x69] sm:$0xff]  ;;  %v1420_v51 = vld [vmem:[%s4232_s25 + $0x73] sm:$0xff]  ;;  %v268_v53 = vpack.c.bf16 %v238_v46, %v237_v45  ;;  %v1449_v54 = vpack.c.bf16 %v1419_v48, %v1418_v47 }
  0x1a   : > { %v1421_v52 = vld [vmem:[%s4232_s25 + $0x7b] sm:$0xff]  ;;  %v269_v55 = vpack.c.bf16 %v240_v50, %v239_v49  ;;  %v241_v57 = vld [vmem:[%s4232_s25 + $0x71] sm:$0xff]  ;;  %v1422_v59 = vld [vmem:[%s4232_s25 + $0x83] sm:$0xff] }
  0x1b   : > { %v1450_v56 = vpack.c.bf16 %v1421_v52, %v1420_v51  ;;  %v242_v58 = vld [vmem:[%s4232_s25 + $0x79] sm:$0xff]  ;;  %v1423_v60 = vld [vmem:[%s4232_s25 + $0x8b] sm:$0xff]  ;;  %v243_v61 = vld [vmem:[%s4232_s25 + $0x81] sm:$0xff] }
  0x1c   : > { %v244_v62 = vld [vmem:[%s4232_s25 + $0x89] sm:$0xff]  ;;  %v1424_v63 = vld [vmem:[%s4232_s25 + $0x93] sm:$0xff]  ;;  %v1425_v0 = vld [vmem:[%s4232_s25 + $0x9b] sm:$0xff]  ;;  %v270_v1 = vpack.c.bf16 %v242_v58, %v241_v57  ;;  %v1451_v2 = vpack.c.bf16 %v1423_v60, %v1422_v59 }
  0x1d   : > { %v271_v3 = vpack.c.bf16 %v244_v62, %v243_v61  ;;  %v1452_v4 = vpack.c.bf16 %v1425_v0, %v1424_v63  ;;  %v245_v6 = vld [vmem:[%s4232_s25 + $0x91] sm:$0xff]  ;;  %v246_v8 = vld [vmem:[%s4232_s25 + $0x99] sm:$0xff]  ;;  %v1426_v9 = vld [vmem:[%s4232_s25 + $0xa3] sm:$0xff] }
  0x1e   : > { %3531 = vmatmul.mubr.msk.bf16.gmra.mrb[4].mxu1 %vm283_vm2, %v266_v41  ;;  %3683 = vmatmul.mubr.msk.bf16.gmra.mrb[4].mxu0 %vm283_vm2, %v1447_v42  ;;  %v1427_v10 = vld [vmem:[%s4232_s25 + $0xab] sm:$0xff]  ;;  %v247_v11 = vld [vmem:[%s4232_s25 + $0xa1] sm:$0xff]  ;;  %v1734_v13 = vld [vmem:[%s4232_s25 + $0x14] sm:$0xff]  ;;  %v272_v15 = vpack.c.bf16 %v246_v8, %v245_v6 }
  0x1f   : > { %3534 = vmatprep.mubr.msk.bf16.mxu1 %vm283_vm2, %v267_v43  ;;  %3686 = vmatprep.mubr.msk.bf16.mxu0 %vm283_vm2, %v1448_v44  ;;  %v248_v12 = vld [vmem:[%s4232_s25 + $0xa9] sm:$0xff]  ;;  %v1735_v14 = vld [vmem:[%s4232_s25 + $0x1c] sm:$0xff]  ;;  %v1453_v16 = vpack.c.bf16 %v1427_v10, %v1426_v9  ;;  %v249_v19 = vld [vmem:[%s4232_s25 + $0xb1] sm:$0xff] }
  0x20   : > { %v273_v17 = vpack.c.bf16 %v248_v12, %v247_v11  ;;  %v1770_v18 = vpack.c.bf16 %v1735_v14, %v1734_v13  ;;  %v250_v20 = vld [vmem:[%s4232_s25 + $0xb9] sm:$0xff]  ;;  %v1736_v21 = vld [vmem:[%s4232_s25 + $0x24] sm:$0xff]  ;;  %v1737_v22 = vld [vmem:[%s4232_s25 + $0x2c] sm:$0xff] }
  0x21   : > { %v251_v23 = vld [vmem:[%s4232_s25 + $0xc1] sm:$0xff]  ;;  %v252_v24 = vld [vmem:[%s4232_s25 + $0xc9] sm:$0xff]  ;;  %v1738_v25 = vld [vmem:[%s4232_s25 + $0x34] sm:$0xff]  ;;  %v274_v27 = vpack.c.bf16 %v250_v20, %v249_v19  ;;  %v4325_v30 = vpack.c.bf16 %v1737_v22, %v1736_v21 }
  0x22   : > { %v1739_v26 = vld [vmem:[%s4232_s25 + $0x3c] sm:$0xff]  ;;  %v3312_v28 = vld [vmem:[%s4971_s1 + $0xe] sm:$0x3]  ;;  %v275_v31 = vpack.c.bf16 %v252_v24, %v251_v23  ;;  %v253_v35 = vld [vmem:[%s4232_s25 + $0xd1] sm:$0xff] }
  0x23   : > { %v4327_v33 = vpack.c.bf16 %v1739_v26, %v1738_v25  ;;  %v4330_v34 = vand.u32 %v3312_v28, %v4213_v5  ;;  %v254_v36 = vld [vmem:[%s4232_s25 + $0xd9] sm:$0xff]  ;;  %v1740_v37 = vld [vmem:[%s4232_s25 + $0x44] sm:$0xff]  ;;  %v1741_v38 = vld [vmem:[%s4232_s25 + $0x4c] sm:$0xff] }
  0x24   : > { %v255_v39 = vld [vmem:[%s4232_s25 + $0xe1] sm:$0xff]  ;;  %v256_v40 = vld [vmem:[%s4232_s25 + $0xe9] sm:$0xff]  ;;  %v1742_v41 = vld [vmem:[%s4232_s25 + $0x54] sm:$0xff]  ;;  %v276_v43 = vpack.c.bf16 %v254_v36, %v253_v35  ;;  %v4348_v44 = vpack.c.bf16 %v1741_v38, %v1740_v37 }
  0x25   : > { %v1743_v42 = vld [vmem:[%s4232_s25 + $0x5c] sm:$0xff]  ;;  %v257_v46 = vld [vmem:[%s4232_s25 + $0xf1] sm:$0xff]  ;;  %v1744_v48 = vld [vmem:[%s4232_s25 + $0x64] sm:$0xff] }
  0x26   : > { %3535 = vmatmul.mubr.msk.bf16.gmra.mrb[8].mxu1 %vm283_vm2, %v268_v53  ;;  %3687 = vmatmul.mubr.msk.bf16.gmra.mrb[8].mxu0 %vm283_vm2, %v1449_v54  ;;  %v4350_v45 = vpack.c.bf16 %v1743_v42, %v1742_v41  ;;  %v258_v47 = vld [vmem:[%s4232_s25 + $0xf9] sm:$0xff]  ;;  %v1745_v49 = vld [vmem:[%s4232_s25 + $0x6c] sm:$0xff]  ;;  %v259_v50 = vld [vmem:[%s4232_s25 + $0x101] sm:$0xff] }
  0x27   : > { %3538 = vmatprep.mubr.msk.bf16.mxu1 %vm283_vm2, %v269_v55  ;;  %3690 = vmatprep.mubr.msk.bf16.mxu0 %vm283_vm2, %v1450_v56  ;;  %v260_v51 = vld [vmem:[%s4232_s25 + $0x109] sm:$0xff]  ;;  %v1746_v52 = vld [vmem:[%s4232_s25 + $0x74] sm:$0xff]  ;;  %v1747_v53 = vld [vmem:[%s4232_s25 + $0x7c] sm:$0xff]  ;;  %v278_v54 = vpack.c.bf16 %v258_v47, %v257_v46  ;;  %v4366_v55 = vpack.c.bf16 %v1745_v49, %v1744_v48 }
  0x28   : > { %v279_v56 = vpack.c.bf16 %v260_v51, %v259_v50  ;;  %v4368_v57 = vpack.c.bf16 %v1747_v53, %v1746_v52  ;;  %v261_v58 = vld [vmem:[%s4232_s25 + $0x111] sm:$0xff]  ;;  %v262_v59 = vld [vmem:[%s4232_s25 + $0x119] sm:$0xff]  ;;  %v1748_v60 = vld [vmem:[%s4232_s25 + $0x84] sm:$0xff] }
  0x29   : > { %v1749_v61 = vld [vmem:[%s4232_s25 + $0x8c] sm:$0xff]  ;;  %v172_v62 = vld [vmem:[%s4232_s25] sm:$0xff]  ;;  %v1750_v0 = vld [vmem:[%s4232_s25 + $0x94] sm:$0xff] }
  0x2a   : > { %v173_v63 = vld [vmem:[%s4232_s25 + $0x8] sm:$0xff]  ;;  %v174_v8 = vld [vmem:[%s4232_s25 + $0x10] sm:$0xff]  ;;  %v175_v9 = vld [vmem:[%s4232_s25 + $0x18] sm:$0xff] }
  0x2b   : > { %v1752_v10 = vld [vmem:[%s4232_s25 + $0xa4] sm:$0xff]  ;;  %v1753_v11 = vld [vmem:[%s4232_s25 + $0xac] sm:$0xff]  ;;  %v1754_v14 = vld [vmem:[%s4232_s25 + $0xb4] sm:$0xff] }
  0x2c   : > { %v176_v12 = vld [vmem:[%s4232_s25 + $0x20] sm:$0xff]  ;;  %v177_v13 = vld [vmem:[%s4232_s25 + $0x28] sm:$0xff]  ;;  %v178_v22 = vld [vmem:[%s4232_s25 + $0x30] sm:$0xff] }
  0x2d   : > { %v210_v19 = vpack.c.bf16 %v177_v13, %v176_v12  ;;  %v179_v23 = vld [vmem:[%s4232_s25 + $0x38] sm:$0xff]  ;;  %v1756_v24 = vld [vmem:[%s4232_s25 + $0xc4] sm:$0xff]  ;;  %v1757_v25 = vld [vmem:[%s4232_s25 + $0xcc] sm:$0xff] }
  0x2e   : > { %3539 = vmatmul.mubr.msk.bf16.gmra.mrb[12].mxu1 %vm283_vm2, %v270_v1  ;;  %3691 = vmatmul.mubr.msk.bf16.gmra.mrb[12].mxu0 %vm283_vm2, %v1451_v2  ;;  %v1751_v1 = vld [vmem:[%s4232_s25 + $0x9c] sm:$0xff]  ;;  %v280_v2 = vpack.c.bf16 %v262_v59, %v261_v58  ;;  %v1758_v28 = vld [vmem:[%s4232_s25 + $0xd4] sm:$0xff]  ;;  %v211_v35 = vpack.c.bf16 %v179_v23, %v178_v22  ;;  %v4428_v36 = vpack.c.bf16 %v1757_v25, %v1756_v24  ;;  %v1761_v41 = vld [vmem:[%s4232_s25 + $0xec] sm:$0xff] }
  0x2f   : > { %3542 = vmatprep.mubr.msk.bf16.mxu1 %vm283_vm2, %v271_v3  ;;  %3694 = vmatprep.mubr.msk.bf16.mxu0 %vm283_vm2, %v1452_v4  ;;  %v4384_v3 = vpack.c.bf16 %v1749_v61, %v1748_v60  ;;  %v208_v4 = vpack.c.bf16 %v173_v63, %v172_v62  ;;  %v4386_v6 = vpack.c.bf16 %v1751_v1, %v1750_v0  ;;  %v180_v26 = vld [vmem:[%s4232_s25 + $0x40] sm:$0xff]  ;;  %v186_v51 = vld [vmem:[%s4232_s25 + $0x70] sm:$0xff]  ;;  %v187_v52 = vld [vmem:[%s4232_s25 + $0x78] sm:$0xff] }
  0x30   : > { %v184_v42 = vld [vmem:[%s4232_s25 + $0x60] sm:$0xff]  ;;  %v189_v58 = vld [vmem:[%s4232_s25 + $0x88] sm:$0xff]  ;;  %v1766_v59 = vld [vmem:[%s4232_s25 + $0x114] sm:$0xff]  ;;  %v215_v61 = vpack.c.bf16 %v187_v52, %v186_v51 }
  0x31   : > { %v1763_v46 = vld [vmem:[%s4232_s25 + $0xfc] sm:$0xff]  ;;  %v1764_v53 = vld [vmem:[%s4232_s25 + $0x104] sm:$0xff]  ;;  %v190_v1 = vld [vmem:[%s4232_s25 + $0x90] sm:$0xff] }
  0x32   : > { %v1767_v60 = vld [vmem:[%s4232_s25 + $0x11c] sm:$0xff]  ;;  %v3331_v22 = vld [vmem:[%s4971_s1 + $0x10] sm:$0x3] }
  0x33   : > { %v4466_v0 = vpack.c.bf16 %v1767_v60, %v1766_v59  ;;  %v4496_v24 = vand.u32 %v3331_v22, %v4213_v5  ;;  %v199_v25 = vld [vmem:[%s4232_s25 + $0xd8] sm:$0xff]  ;;  %v768_v52 = vld [vmem:[%s4232_s25 + $0x62] sm:$0xff]  ;;  %v773_v59 = vld [vmem:[%s4232_s25 + $0x8a] sm:$0xff] }
  0x34   : > { %v2390_v22 = vld [vmem:[%s4232_s25 + $0x45] sm:$0xff] }
  0x36   : > { %3543 = vmatmul.mubr.msk.bf16.gmra.mrb[16].mxu1 %vm283_vm2, %v272_v15  ;;  %3695 = vmatmul.mubr.msk.bf16.gmra.mrb[16].mxu0 %vm283_vm2, %v1453_v16  ;;  %v1755_v15 = vld [vmem:[%s4232_s25 + $0xbc] sm:$0xff]  ;;  %v209_v16 = vpack.c.bf16 %v175_v9, %v174_v8  ;;  %v1769_v8 = vld [vmem:[%s4232_s25 + $0x12c] sm:$0xff] }
  0x37   : > { %3546 = vmatprep.mubr.msk.bf16.mxu1 %vm283_vm2, %v273_v17  ;;  %3716 = vmatprep.mubr.msk.bf16.mxu0 %vm283_vm2, %v1770_v18  ;;  %v3236_v17 = vld [vmem:[%s4971_s1 + $0x6] sm:$0x3]  ;;  %v4405_v18 = vpack.c.bf16 %v1753_v11, %v1752_v10  ;;  %v4407_v20 = vpack.c.bf16 %v1755_v15, %v1754_v14  ;;  %v193_v10 = vld [vmem:[%s4232_s25 + $0xa8] sm:$0xff]  ;;  %v194_v14 = vld [vmem:[%s4232_s25 + $0xb0] sm:$0xff] }
  0x38   : > { %v4410_v21 = vand.u32 %v3236_v17, %v4213_v5  ;;  %v192_v9 = vld [vmem:[%s4232_s25 + $0xa0] sm:$0xff]  ;;  %v195_v15 = vld [vmem:[%s4232_s25 + $0xb8] sm:$0xff]  ;;  %v197_v17 = vld [vmem:[%s4232_s25 + $0xc8] sm:$0xff] }
  0x39   : > { %v218_v13 = vpack.c.bf16 %v193_v10, %v192_v9  ;;  %v200_v5 = vld [vmem:[%s4232_s25 + $0xe0] sm:$0xff] }
  0x3e   : > { %3547 = vmatmul.mubr.msk.bf16.gmra.mrb[20].mxu1 %vm283_vm2, %v274_v27  ;;  %3717 = vmatmul.mubr.msk.bf16.vlgmr.msra.gmra.mrb[0].mxu0 %vm283_vm2, %v4325_v30  ;;  %v181_v27 = vld [vmem:[%s4232_s25 + $0x48] sm:$0xff] }
  0x3f   : > { %3550 = vmatprep.mubr.msk.bf16.mxu1 %vm283_vm2, %v275_v31  ;;  %3753 = vmatpush3.bf16.msra.mxu0 %v4254_v29  ;;  %v277_v29 = vpack.c.bf16 %v256_v40, %v255_v39  ;;  %v1759_v31 = vld [vmem:[%s4232_s25 + $0xdc] sm:$0xff]  ;;  %v212_v37 = vpack.c.bf16 %v181_v27, %v180_v26  ;;  %v1760_v40 = vld [vmem:[%s4232_s25 + $0xe4] sm:$0xff] }
  0x40   : > { %3720 = vmatprep.mubr.msk.bf16.mxu0 %vm283_vm2, %v4327_v33  ;;  %3790 = vmatprep.subr.bf16.mxu0 %v4330_v34  ;;  %v4430_v38 = vpack.c.bf16 %v1759_v31, %v1758_v28  ;;  %v183_v39 = vld [vmem:[%s4232_s25 + $0x58] sm:$0xff]  ;;  %v4446_v48 = vpack.c.bf16 %v1761_v41, %v1760_v40  ;;  %v201_v26 = vld [vmem:[%s4232_s25 + $0xe8] sm:$0xff] }
  0x41   : > { %v222_v28 = vpack.c.bf16 %v201_v26, %v200_v5  ;;  %v205_v31 = vld [vmem:[%s4232_s25 + $0x108] sm:$0xff] }
  0x46   : > { %3551 = vmatmul.mubr.msk.bf16.gmra.mrb[24].mxu1 %vm283_vm2, %v276_v43  ;;  %3721 = vmatmul.mubr.msk.bf16.gmra.mrb[4].mxu0 %vm283_vm2, %v4348_v44  ;;  %v185_v43 = vld [vmem:[%s4232_s25 + $0x68] sm:$0xff] }
  0x47   : > { %3554 = vmatprep.mubr.msk.bf16.mxu1 %vm283_vm2, %v277_v29  ;;  %3724 = vmatprep.mubr.msk.bf16.mxu0 %vm283_vm2, %v4350_v45  ;;  %v1762_v29 = vld [vmem:[%s4232_s25 + $0xf4] sm:$0xff]  ;;  %v214_v49 = vpack.c.bf16 %v185_v43, %v184_v42  ;;  %v761_v43 = vld [vmem:[%s4232_s25 + $0x2a] sm:$0xff] }
  0x48   : > { %v4448_v50 = vpack.c.bf16 %v1763_v46, %v1762_v29  ;;  %v759_v42 = vld [vmem:[%s4232_s25 + $0x1a] sm:$0xff] }
  0x4e   : > { %3555 = vmatmul.mubr.msk.bf16.gmra.mrb[28].mxu1 %vm283_vm2, %v278_v54  ;;  %3725 = vmatmul.mubr.msk.bf16.gmra.mrb[8].mxu0 %vm283_vm2, %v4366_v55  ;;  %v1765_v54 = vld [vmem:[%s4232_s25 + $0x10c] sm:$0xff] }
  0x4f   : > { %3558 = vmatprep.mubr.msk.bf16.mxu1 %vm283_vm2, %v279_v56  ;;  %3728 = vmatprep.mubr.msk.bf16.mxu0 %vm283_vm2, %v4368_v57  ;;  %v188_v56 = vld [vmem:[%s4232_s25 + $0x80] sm:$0xff]  ;;  %v4464_v62 = vpack.c.bf16 %v1765_v54, %v1764_v53  ;;  %v769_v53 = vld [vmem:[%s4232_s25 + $0x6a] sm:$0xff] }
  0x50   : > { %v216_v63 = vpack.c.bf16 %v189_v58, %v188_v56  ;;  %v4576_v56 = vpack.c.bf16 %v769_v53, %v768_v52  ;;  %v772_v58 = vld [vmem:[%s4232_s25 + $0x82] sm:$0xff]  ;;  %v791_v52 = vld [vmem:[%s4232_s25 + $0x11a] sm:$0xff] }
  0x51   : > { %v2400_v53 = vld [vmem:[%s4232_s25 + $0x95] sm:$0xff] }
  0x56   : > { %3559 = vmatmul.mubr.msk.bf16.gmra.mrb[32].mxu1 %vm283_vm2, %v280_v2  ;;  %3729 = vmatmul.mubr.msk.bf16.gmra.mrb[12].mxu0 %vm283_vm2, %v4384_v3  ;;  %v191_v2 = vld [vmem:[%s4232_s25 + $0x98] sm:$0xff] }
  0x57   : > { %3564 = vmatprep.mubr.msk.bf16.mxu1 %vm283_vm2, %v208_v4  ;;  %3732 = vmatprep.mubr.msk.bf16.mxu0 %vm283_vm2, %v4386_v6  ;;  %v1768_v4 = vld [vmem:[%s4232_s25 + $0x124] sm:$0xff]  ;;  %v217_v11 = vpack.c.bf16 %v191_v2, %v190_v1  ;;  %v2095_v1 = vld [vmem:[%s4232_s25 + $0x13c] sm:$0xff] }
  0x58   : > { %v4480_v12 = vpack.c.bf16 %v1769_v8, %v1768_v4  ;;  %v776_v2 = vld [vmem:[%s4232_s25 + $0xa2] sm:$0xff]  ;;  %v777_v4 = vld [vmem:[%s4232_s25 + $0xaa] sm:$0xff] }
  0x59   : > { %v2386_v8 = vld [vmem:[%s4232_s25 + $0x25] sm:$0xff] }
  0x5e   : > { %3565 = vmatmul.mubr.msk.bf16.vlgmr.msra.gmra.mrb[0].mxu1 %vm283_vm2, %v209_v16  ;;  %3733 = vmatmul.mubr.msk.bf16.gmra.mrb[16].mxu0 %vm283_vm2, %v4405_v18  ;;  %v196_v16 = vld [vmem:[%s4232_s25 + $0xc0] sm:$0xff] }
  0x5f   : > { %3568 = vmatprep.mubr.msk.bf16.mxu1 %vm283_vm2, %v210_v19  ;;  %3736 = vmatprep.mubr.msk.bf16.mxu0 %vm283_vm2, %v4407_v20  ;;  %v219_v19 = vpack.c.bf16 %v195_v15, %v194_v14  ;;  %v220_v23 = vpack.c.bf16 %v197_v17, %v196_v16  ;;  %v779_v14 = vld [vmem:[%s4232_s25 + $0xba] sm:$0xff]  ;;  %v780_v17 = vld [vmem:[%s4232_s25 + $0xc2] sm:$0xff] }
  0x60   : > { %3601 = vmatpush3.bf16.msra.mxu1 %v4259_v32  ;;  %v182_v32 = vld [vmem:[%s4232_s25 + $0x50] sm:$0xff]  ;;  %v2389_v16 = vld [vmem:[%s4232_s25 + $0x3d] sm:$0xff] }
  0x61   : > { %3638 = vmatprep.subr.bf16.mxu1 %v4410_v21  ;;  %v213_v47 = vpack.c.bf16 %v183_v39, %v182_v32  ;;  %v207_v32 = vld [vmem:[%s4232_s25 + $0x118] sm:$0xff]  ;;  %v757_v39 = vld [vmem:[%s4232_s25 + $0xa] sm:$0xff] }
  0x62   : > { %v2388_v15 = vld [vmem:[%s4232_s25 + $0x35] sm:$0xff] }
  0x66   : > { %3569 = vmatmul.mubr.msk.bf16.gmra.mrb[4].mxu1 %vm283_vm2, %v211_v35  ;;  %3737 = vmatmul.mubr.msk.bf16.gmra.mrb[20].mxu0 %vm283_vm2, %v4428_v36 }
  0x67   : > { %3572 = vmatprep.mubr.msk.bf16.mxu1 %vm283_vm2, %v212_v37  ;;  %3740 = vmatprep.mubr.msk.bf16.mxu0 %vm283_vm2, %v4430_v38 }
  0x6e   : > { %3573 = vmatmul.mubr.msk.bf16.gmra.mrb[8].mxu1 %vm283_vm2, %v213_v47  ;;  %3741 = vmatmul.mubr.msk.bf16.gmra.mrb[24].mxu0 %vm283_vm2, %v4446_v48  ;;  %v764_v47 = vld [vmem:[%s4232_s25 + $0x42] sm:$0xff] }
  0x6f   : > { %3576 = vmatprep.mubr.msk.bf16.mxu1 %vm283_vm2, %v214_v49  ;;  %3744 = vmatprep.mubr.msk.bf16.mxu0 %vm283_vm2, %v4448_v50  ;;  %v765_v49 = vld [vmem:[%s4232_s25 + $0x4a] sm:$0xff] }
  0x76   : > { %3577 = vmatmul.mubr.msk.bf16.gmra.mrb[12].mxu1 %vm283_vm2, %v215_v61  ;;  %3745 = vmatmul.mubr.msk.bf16.gmra.mrb[28].mxu0 %vm283_vm2, %v4464_v62  ;;  %v4592_v61 = vpack.c.bf16 %v773_v59, %v772_v58  ;;  %v2403_v58 = vld [vmem:[%s4232_s25 + $0xad] sm:$0xff] }
  0x77   : > { %3580 = vmatprep.mubr.msk.bf16.mxu1 %vm283_vm2, %v216_v63  ;;  %3748 = vmatprep.mubr.msk.bf16.mxu0 %vm283_vm2, %v4466_v0  ;;  %v775_v63 = vld [vmem:[%s4232_s25 + $0x9a] sm:$0xff] }
  0x7e   : > { %3581 = vmatmul.mubr.msk.bf16.gmra.mrb[16].mxu1 %vm283_vm2, %v217_v11  ;;  %3749 = vmatmul.mubr.msk.bf16.gmra.mrb[32].mxu0 %vm283_vm2, %v4480_v12  ;;  %v4612_v11 = vpack.c.bf16 %v777_v4, %v776_v2  ;;  %v2406_v2 = vld [vmem:[%s4232_s25 + $0xc5] sm:$0xff]  ;;  %v2407_v4 = vld [vmem:[%s4232_s25 + $0xcd] sm:$0xff] }
  0x7f   : > { %3584 = vmatprep.mubr.msk.bf16.mxu1 %vm283_vm2, %v218_v13  ;;  %3754 = vmatprep.mubr.msk.bf16.mxu0 %vm283_vm2, %v4325_v30  ;;  %v198_v30 = vld [vmem:[%s4232_s25 + $0xd0] sm:$0xff] }
  0x80   : > { %v221_v27 = vpack.c.bf16 %v199_v25, %v198_v30  ;;  %v2423_v25 = vpack.c.bf16 %v2389_v16, %v2388_v15  ;;  %v2415_v16 = vld [vmem:[%s4232_s25 + $0x10d] sm:$0xff] }
  0x86   : > { %3585 = vmatmul.mubr.msk.bf16.gmra.mrb[20].mxu1 %vm283_vm2, %v219_v19  ;;  %3755 = vmatmul.mubr.msk.bf16.vlgmr.msra.gmra.mrb[0].mxu0 %vm283_vm2, %v4327_v33  ;;  %v202_v33 = vld [vmem:[%s4232_s25 + $0xf0] sm:$0xff] }
  0x87   : > { %3588 = vmatprep.mubr.msk.bf16.mxu1 %vm283_vm2, %v220_v23  ;;  %3791 = vmatpush3.bf16.msra.mxu0 %v4330_v34  ;;  %v203_v34 = vld [vmem:[%s4232_s25 + $0xf8] sm:$0xff]  ;;  %v781_v19 = vld [vmem:[%s4232_s25 + $0xca] sm:$0xff] }
  0x88   : > { %3758 = vmatprep.mubr.msk.bf16.mxu0 %vm283_vm2, %v4348_v44  ;;  %3828 = vmatprep.subr.bf16.mxu0 %v4496_v24  ;;  %v204_v44 = vld [vmem:[%s4232_s25 + $0x100] sm:$0xff]  ;;  %v223_v35 = vpack.c.bf16 %v203_v34, %v202_v33  ;;  %v2391_v23 = vld [vmem:[%s4232_s25 + $0x4d] sm:$0xff]  ;;  %v4630_v5 = vpack.c.bf16 %v781_v19, %v780_v17  ;;  %v2392_v33 = vld [vmem:[%s4232_s25 + $0x55] sm:$0xff] }
  0x89   : > { %v224_v37 = vpack.c.bf16 %v205_v31, %v204_v44  ;;  %v2424_v26 = vpack.c.bf16 %v2391_v23, %v2390_v22  ;;  %v2393_v34 = vld [vmem:[%s4232_s25 + $0x5d] sm:$0xff]  ;;  %v785_v31 = vld [vmem:[%s4232_s25 + $0xea] sm:$0xff] }
  0x8a   : > { %v784_v44 = vld [vmem:[%s4232_s25 + $0xe2] sm:$0xff]  ;;  %v2419_v23 = vld [vmem:[%s4232_s25 + $0x12d] sm:$0xff] }
  0x8b   : > { %v2418_v22 = vld [vmem:[%s4232_s25 + $0x125] sm:$0xff] }
  0x8e   : > { %3589 = vmatmul.mubr.msk.bf16.gmra.mrb[24].mxu1 %vm283_vm2, %v221_v27  ;;  %3759 = vmatmul.mubr.msk.bf16.gmra.mrb[4].mxu0 %vm283_vm2, %v4350_v45  ;;  %v206_v45 = vld [vmem:[%s4232_s25 + $0x110] sm:$0xff] }
  0x8f   : > { %3592 = vmatprep.mubr.msk.bf16.mxu1 %vm283_vm2, %v222_v28  ;;  %3762 = vmatprep.mubr.msk.bf16.mxu0 %vm283_vm2, %v4366_v55  ;;  %v756_v55 = vld [vmem:[%s4232_s25 + $0x2] sm:$0xff]  ;;  %v225_v40 = vpack.c.bf16 %v207_v32, %v206_v45  ;;  %v782_v27 = vld [vmem:[%s4232_s25 + $0xd2] sm:$0xff]  ;;  %v783_v28 = vld [vmem:[%s4232_s25 + $0xda] sm:$0xff]  ;;  %v2425_v32 = vpack.c.bf16 %v2393_v34, %v2392_v33 }
  0x90   : > { %v792_v41 = vpack.c.bf16 %v757_v39, %v756_v55  ;;  %v4647_v45 = vpack.c.bf16 %v783_v28, %v782_v27  ;;  %v4649_v55 = vpack.c.bf16 %v785_v31, %v784_v44  ;;  %v2712_v27 = vld [vmem:[%s4232_s25 + $0x26] sm:$0xff]  ;;  %v2713_v28 = vld [vmem:[%s4232_s25 + $0x2e] sm:$0xff] }
  0x91   : > { %v2748_v34 = vpack.c.bf16 %v2713_v28, %v2712_v27  ;;  %v2716_v44 = vld [vmem:[%s4232_s25 + $0x46] sm:$0xff]  ;;  %v2717_v31 = vld [vmem:[%s4232_s25 + $0x4e] sm:$0xff] }
  0x92   : > { %v2740_v27 = vld [vmem:[%s4232_s25 + $0x106] sm:$0xff]  ;;  %v2741_v28 = vld [vmem:[%s4232_s25 + $0x10e] sm:$0xff] }
  0x96   : > { %3593 = vmatmul.mubr.msk.bf16.gmra.mrb[28].mxu1 %vm283_vm2, %v223_v35  ;;  %3763 = vmatmul.mubr.msk.bf16.gmra.mrb[8].mxu0 %vm283_vm2, %v4368_v57  ;;  %v758_v57 = vld [vmem:[%s4232_s25 + $0x12] sm:$0xff]  ;;  %v2394_v35 = vld [vmem:[%s4232_s25 + $0x65] sm:$0xff] }
  0x97   : > { %3596 = vmatprep.mubr.msk.bf16.mxu1 %vm283_vm2, %v224_v37  ;;  %3766 = vmatprep.mubr.msk.bf16.mxu0 %vm283_vm2, %v4384_v3  ;;  %v760_v3 = vld [vmem:[%s4232_s25 + $0x22] sm:$0xff]  ;;  %v4540_v29 = vpack.c.bf16 %v759_v42, %v758_v57  ;;  %v2395_v37 = vld [vmem:[%s4232_s25 + $0x6d] sm:$0xff] }
  0x98   : > { %v4542_v46 = vpack.c.bf16 %v761_v43, %v760_v3  ;;  %v2426_v39 = vpack.c.bf16 %v2395_v37, %v2394_v35  ;;  %v2397_v57 = vld [vmem:[%s4232_s25 + $0x7d] sm:$0xff]  ;;  %v789_v3 = vld [vmem:[%s4232_s25 + $0x10a] sm:$0xff]  ;;  %v2750_v37 = vpack.c.bf16 %v2717_v31, %v2716_v44 }
  0x99   : > { %v788_v42 = vld [vmem:[%s4232_s25 + $0x102] sm:$0xff]  ;;  %v1443_v31 = vld [vmem:[%s4232_s25 + $0x12b] sm:$0xff] }
  0x9a   : > { %v2398_v43 = vld [vmem:[%s4232_s25 + $0x85] sm:$0xff] }
  0x9b   : > { %v1442_v44 = vld [vmem:[%s4232_s25 + $0x123] sm:$0xff] }
  0x9e   : > { %3597 = vmatmul.mubr.msk.bf16.gmra.mrb[32].mxu1 %vm283_vm2, %v225_v40  ;;  %3767 = vmatmul.mubr.msk.bf16.gmra.mrb[12].mxu0 %vm283_vm2, %v4386_v6  ;;  %v762_v6 = vld [vmem:[%s4232_s25 + $0x32] sm:$0xff]  ;;  %v787_v40 = vld [vmem:[%s4232_s25 + $0xfa] sm:$0xff] }
  0x9f   : > { %3602 = vmatprep.mubr.msk.bf16.mxu1 %vm283_vm2, %v792_v41  ;;  %3770 = vmatprep.mubr.msk.bf16.mxu0 %vm283_vm2, %v4405_v18  ;;  %v763_v18 = vld [vmem:[%s4232_s25 + $0x3a] sm:$0xff] }
  0xa0   : > { %v4558_v51 = vpack.c.bf16 %v763_v18, %v762_v6  ;;  %v2396_v41 = vld [vmem:[%s4232_s25 + $0x75] sm:$0xff]  ;;  %v2399_v6 = vld [vmem:[%s4232_s25 + $0x8d] sm:$0xff] }
  0xa6   : > { %3603 = vmatmul.mubr.msk.bf16.vlgmr.msra.gmra.mrb[0].mxu1 %vm283_vm2, %v4540_v29  ;;  %3771 = vmatmul.mubr.msk.bf16.gmra.mrb[16].mxu0 %vm283_vm2, %v4407_v20  ;;  %v4560_v20 = vpack.c.bf16 %v765_v49, %v764_v47  ;;  %v2427_v47 = vpack.c.bf16 %v2397_v57, %v2396_v41  ;;  %v4667_v49 = vpack.c.bf16 %v789_v3, %v788_v42  ;;  %v2724_v41 = vld [vmem:[%s4232_s25 + $0x86] sm:$0xff]  ;;  %v2725_v57 = vld [vmem:[%s4232_s25 + $0x8e] sm:$0xff] }
  0xa7   : > { %3606 = vmatprep.mubr.msk.bf16.mxu1 %vm283_vm2, %v4542_v46  ;;  %3774 = vmatprep.mubr.msk.bf16.mxu0 %vm283_vm2, %v4428_v36  ;;  %v767_v36 = vld [vmem:[%s4232_s25 + $0x5a] sm:$0xff]  ;;  %v2754_v3 = vpack.c.bf16 %v2725_v57, %v2724_v41 }
  0xa8   : > { %3639 = vmatpush3.bf16.msra.mxu1 %v4410_v21  ;;  %v766_v21 = vld [vmem:[%s4232_s25 + $0x52] sm:$0xff] }
  0xa9   : > { %3866 = vmatprep.subr.bf16.mxu1 %v4221_v7  ;;  %v4574_v54 = vpack.c.bf16 %v767_v36, %v766_v21  ;;  %v2428_v21 = vpack.c.bf16 %v2399_v6, %v2398_v43  ;;  %v790_v36 = vld [vmem:[%s4232_s25 + $0x112] sm:$0xff]  ;;  %v1117_v43 = vld [vmem:[%s4232_s25 + $0x12a] sm:$0xff] }
  0xaa   : > { %v4681_v59 = vpack.c.bf16 %v791_v52, %v790_v36  ;;  %v2726_v6 = vld [vmem:[%s4232_s25 + $0x96] sm:$0xff]  ;;  %v2729_v36 = vld [vmem:[%s4232_s25 + $0xae] sm:$0xff] }
  0xae   : > { %3607 = vmatmul.mubr.msk.bf16.gmra.mrb[4].mxu1 %vm283_vm2, %v4558_v51  ;;  %3775 = vmatmul.mubr.msk.bf16.gmra.mrb[20].mxu0 %vm283_vm2, %v4430_v38  ;;  %v770_v38 = vld [vmem:[%s4232_s25 + $0x72] sm:$0xff] }
  0xaf   : > { %3610 = vmatprep.mubr.msk.bf16.mxu1 %vm283_vm2, %v4560_v20  ;;  %3778 = vmatprep.mubr.msk.bf16.mxu0 %vm283_vm2, %v4446_v48  ;;  %v771_v48 = vld [vmem:[%s4232_s25 + $0x7a] sm:$0xff] }
  0xb0   : > { %v4590_v60 = vpack.c.bf16 %v771_v48, %v770_v38  ;;  %v2401_v38 = vld [vmem:[%s4232_s25 + $0x9d] sm:$0xff]  ;;  %v2402_v48 = vld [vmem:[%s4232_s25 + $0xa5] sm:$0xff] }
  0xb6   : > { %3611 = vmatmul.mubr.msk.bf16.gmra.mrb[8].mxu1 %vm283_vm2, %v4574_v54  ;;  %3779 = vmatmul.mubr.msk.bf16.gmra.mrb[24].mxu0 %vm283_vm2, %v4448_v50  ;;  %v774_v50 = vld [vmem:[%s4232_s25 + $0x92] sm:$0xff] }
  0xb7   : > { %3614 = vmatprep.mubr.msk.bf16.mxu1 %vm283_vm2, %v4576_v56  ;;  %3782 = vmatprep.mubr.msk.bf16.mxu0 %vm283_vm2, %v4464_v62  ;;  %v2094_v62 = vld [vmem:[%s4232_s25 + $0x134] sm:$0xff]  ;;  %v4610_v9 = vpack.c.bf16 %v775_v63, %v774_v50  ;;  %v2429_v50 = vpack.c.bf16 %v2401_v38, %v2400_v53  ;;  %v2430_v63 = vpack.c.bf16 %v2403_v58, %v2402_v48  ;;  %v1430_v58 = vld [vmem:[%s4232_s25 + $0xc3] sm:$0xff] }
  0xb8   : > { %v2113_v10 = vpack.c.bf16 %v2095_v1, %v2094_v62  ;;  %v2404_v62 = vld [vmem:[%s4232_s25 + $0xb5] sm:$0xff]  ;;  %v2405_v1 = vld [vmem:[%s4232_s25 + $0xbd] sm:$0xff] }
  0xbe   : > { %3615 = vmatmul.mubr.msk.bf16.gmra.mrb[12].mxu1 %vm283_vm2, %v4590_v60  ;;  %3783 = vmatmul.mubr.msk.bf16.gmra.mrb[28].mxu0 %vm283_vm2, %v4466_v0  ;;  %v2387_v0 = vld [vmem:[%s4232_s25 + $0x2d] sm:$0xff] }
  0xbf   : > { %3618 = vmatprep.mubr.msk.bf16.mxu1 %vm283_vm2, %v4592_v61  ;;  %3786 = vmatprep.mubr.msk.bf16.mxu0 %vm283_vm2, %v4480_v12  ;;  %v2422_v13 = vpack.c.bf16 %v2387_v0, %v2386_v8  ;;  %v778_v12 = vld [vmem:[%s4232_s25 + $0xb2] sm:$0xff]  ;;  %v2431_v8 = vpack.c.bf16 %v2405_v1, %v2404_v62  ;;  %v2432_v0 = vpack.c.bf16 %v2407_v4, %v2406_v2  ;;  %v1433_v1 = vld [vmem:[%s4232_s25 + $0xdb] sm:$0xff]  ;;  %v2732_v2 = vld [vmem:[%s4232_s25 + $0xc6] sm:$0xff] }
  0xc0   : > { %v4628_v30 = vpack.c.bf16 %v779_v14, %v778_v12  ;;  %v2411_v12 = vld [vmem:[%s4232_s25 + $0xed] sm:$0xff] }
  0xc1   : > { %v1432_v62 = vld [vmem:[%s4232_s25 + $0xd3] sm:$0xff] }
  0xc2   : > { %v2733_v4 = vld [vmem:[%s4232_s25 + $0xce] sm:$0xff] }
  0xc6   : > { %3619 = vmatmul.mubr.msk.bf16.gmra.mrb[16].mxu1 %vm283_vm2, %v4610_v9  ;;  %3787 = vmatmul.mubr.msk.bf16.gmra.mrb[32].mxu0 %vm283_vm2, %v2113_v10  ;;  %v2409_v10 = vld [vmem:[%s4232_s25 + $0xdd] sm:$0xff] }
  0xc7   : > { %3622 = vmatprep.mubr.msk.bf16.mxu1 %vm283_vm2, %v4612_v11  ;;  %3792 = vmatprep.mubr.msk.bf16.mxu0 %vm283_vm2, %v2422_v13  ;;  %v2410_v13 = vld [vmem:[%s4232_s25 + $0xe5] sm:$0xff] }
  0xc8   : > { %v2434_v15 = vpack.c.bf16 %v2411_v12, %v2410_v13  ;;  %v1434_v13 = vld [vmem:[%s4232_s25 + $0xe3] sm:$0xff]  ;;  %v1435_v12 = vld [vmem:[%s4232_s25 + $0xeb] sm:$0xff] }
  0xce   : > { %3623 = vmatmul.mubr.msk.bf16.gmra.mrb[20].mxu1 %vm283_vm2, %v4628_v30  ;;  %3793 = vmatmul.mubr.msk.bf16.vlgmr.msra.gmra.mrb[0].mxu0 %vm283_vm2, %v2423_v25 }
  0xcf   : > { %3626 = vmatprep.mubr.msk.bf16.mxu1 %vm283_vm2, %v4630_v5  ;;  %3829 = vmatpush3.bf16.msra.mxu0 %v4496_v24  ;;  %v786_v24 = vld [vmem:[%s4232_s25 + $0xf2] sm:$0xff] }
  0xd0   : > { %3796 = vmatprep.mubr.msk.bf16.mxu0 %vm283_vm2, %v2424_v26  ;;  %v4665_v18 = vpack.c.bf16 %v787_v40, %v786_v24  ;;  %v2438_v26 = vpack.c.bf16 %v2419_v23, %v2418_v22  ;;  %v1438_v22 = vld [vmem:[%s4232_s25 + $0x103] sm:$0xff]  ;;  %v1439_v23 = vld [vmem:[%s4232_s25 + $0x10b] sm:$0xff] }
  0xd6   : > { %3627 = vmatmul.mubr.msk.bf16.gmra.mrb[24].mxu1 %vm283_vm2, %v4647_v45  ;;  %3797 = vmatmul.mubr.msk.bf16.gmra.mrb[4].mxu0 %vm283_vm2, %v2425_v32  ;;  %v2720_v32 = vld [vmem:[%s4232_s25 + $0x66] sm:$0xff] }
  0xd7   : > { %3630 = vmatprep.mubr.msk.bf16.mxu1 %vm283_vm2, %v4649_v55  ;;  %3800 = vmatprep.mubr.msk.bf16.mxu0 %vm283_vm2, %v2426_v39  ;;  %v2721_v39 = vld [vmem:[%s4232_s25 + $0x6e] sm:$0xff] }
  0xd8   : > { %v2752_v40 = vpack.c.bf16 %v2721_v39, %v2720_v32  ;;  %v1461_v32 = vpack.c.bf16 %v1443_v31, %v1442_v44 }
  0xde   : > { %3631 = vmatmul.mubr.msk.bf16.gmra.mrb[28].mxu1 %vm283_vm2, %v4665_v18  ;;  %3801 = vmatmul.mubr.msk.bf16.gmra.mrb[8].mxu0 %vm283_vm2, %v2427_v47  ;;  %v1428_v47 = vld [vmem:[%s4232_s25 + $0xb3] sm:$0xff] }
  0xdf   : > { %3634 = vmatprep.mubr.msk.bf16.mxu1 %vm283_vm2, %v4667_v49  ;;  %3804 = vmatprep.mubr.msk.bf16.mxu0 %vm283_vm2, %v2428_v21  ;;  %v1429_v21 = vld [vmem:[%s4232_s25 + $0xbb] sm:$0xff] }
  0xe0   : > { %v1454_v38 = vpack.c.bf16 %v1429_v21, %v1428_v47 }
  0xe6   : > { %3635 = vmatmul.mubr.msk.bf16.gmra.mrb[32].mxu1 %vm283_vm2, %v4681_v59  ;;  %3805 = vmatmul.mubr.msk.bf16.gmra.mrb[12].mxu0 %vm283_vm2, %v2429_v50  ;;  %v2730_v50 = vld [vmem:[%s4232_s25 + $0xb6] sm:$0xff] }
  0xe7   : > { %3640 = vmatprep.mubr.msk.bf16.mxu1 %vm283_vm2, %v4540_v29  ;;  %3808 = vmatprep.mubr.msk.bf16.mxu0 %vm283_vm2, %v2430_v63  ;;  %v2408_v29 = vld [vmem:[%s4232_s25 + $0xd5] sm:$0xff]  ;;  %v2731_v63 = vld [vmem:[%s4232_s25 + $0xbe] sm:$0xff] }
  0xe8   : > { %v2433_v14 = vpack.c.bf16 %v2409_v10, %v2408_v29  ;;  %v1456_v29 = vpack.c.bf16 %v1433_v1, %v1432_v62  ;;  %v2758_v10 = vpack.c.bf16 %v2733_v4, %v2732_v2  ;;  %v4846_v1 = vld [vmem:[%s4972_s2] ss:$0 sm:$0xff] }
  0xee   : > { %3641 = vmatmul.mubr.msk.bf16.vlgmr.msra.gmra.mrb[0].mxu1 %vm283_vm2, %v4542_v46  ;;  %3809 = vmatmul.mubr.msk.bf16.gmra.mrb[16].mxu0 %vm283_vm2, %v2431_v8  ;;  %v2413_v46 = vld [vmem:[%s4232_s25 + $0xfd] sm:$0xff] }
  0xef   : > { %3644 = vmatprep.mubr.msk.bf16.mxu1 %vm283_vm2, %v4558_v51  ;;  %3812 = vmatprep.mubr.msk.bf16.mxu0 %vm283_vm2, %v2432_v0  ;;  %v2414_v51 = vld [vmem:[%s4232_s25 + $0x105] sm:$0xff]  ;;  %v2757_v0 = vpack.c.bf16 %v2731_v63, %v2730_v50 }
  0xf0   : > { %3867 = vmatpush3.bf16.msra.mxu1 %v4221_v7  ;;  %v2412_v7 = vld [vmem:[%s4232_s25 + $0xf5] sm:$0xff]  ;;  %v2436_v19 = vpack.c.bf16 %v2415_v16, %v2414_v51  ;;  %v2736_v51 = vld [vmem:[%s4232_s25 + $0xe6] sm:$0xff] }
  0xf1   : > { %v2435_v17 = vpack.c.bf16 %v2413_v46, %v2412_v7  ;;  %v1436_v7 = vld [vmem:[%s4232_s25 + $0xf3] sm:$0xff]  ;;  %v1437_v46 = vld [vmem:[%s4232_s25 + $0xfb] sm:$0xff] }
  0xf2   : > { %v2737_v16 = vld [vmem:[%s4232_s25 + $0xee] sm:$0xff] }
  0xf6   : > { %3645 = vmatmul.mubr.msk.bf16.gmra.mrb[4].mxu1 %vm283_vm2, %v4560_v20  ;;  %3813 = vmatmul.mubr.msk.bf16.gmra.mrb[20].mxu0 %vm283_vm2, %v2433_v14  ;;  %v2416_v20 = vld [vmem:[%s4232_s25 + $0x115] sm:$0xff] }
  0xf7   : > { %3648 = vmatprep.mubr.msk.bf16.mxu1 %vm283_vm2, %v4574_v54  ;;  %3816 = vmatprep.mubr.msk.bf16.mxu0 %vm283_vm2, %v2434_v15  ;;  %v2417_v54 = vld [vmem:[%s4232_s25 + $0x11d] sm:$0xff] }
  0xf8   : > { %v2437_v25 = vpack.c.bf16 %v2417_v54, %v2416_v20  ;;  %v2734_v14 = vld [vmem:[%s4232_s25 + $0xd6] sm:$0xff]  ;;  %v2735_v15 = vld [vmem:[%s4232_s25 + $0xde] sm:$0xff]  ;;  %v1458_v20 = vpack.c.bf16 %v1437_v46, %v1436_v7  ;;  %v2760_v54 = vpack.c.bf16 %v2737_v16, %v2736_v51 }
  0xfe   : > { %3649 = vmatmul.mubr.msk.bf16.gmra.mrb[8].mxu1 %vm283_vm2, %v4576_v56  ;;  %3817 = vmatmul.mubr.msk.bf16.gmra.mrb[24].mxu0 %vm283_vm2, %v2435_v17  ;;  %v2420_v56 = vld [vmem:[%s4232_s25 + $0x135] sm:$0xff]  ;;  %v1457_v17 = vpack.c.bf16 %v1435_v12, %v1434_v13 }
  0xff   : > { %3652 = vmatprep.mubr.msk.bf16.mxu1 %vm283_vm2, %v4590_v60  ;;  %3820 = vmatprep.mubr.msk.bf16.mxu0 %vm283_vm2, %v2436_v19  ;;  %v2421_v60 = vld [vmem:[%s4232_s25 + $0x13d] sm:$0xff]  ;;  %v2759_v19 = vpack.c.bf16 %v2735_v15, %v2734_v14 }
 0x100   : > { %v2439_v33 = vpack.c.bf16 %v2421_v60, %v2420_v56  ;;  %v1440_v56 = vld [vmem:[%s4232_s25 + $0x113] sm:$0xff]  ;;  %v1441_v60 = vld [vmem:[%s4232_s25 + $0x11b] sm:$0xff] }
 0x106   : > { %3653 = vmatmul.mubr.msk.bf16.gmra.mrb[12].mxu1 %vm283_vm2, %v4592_v61  ;;  %3821 = vmatmul.mubr.msk.bf16.gmra.mrb[28].mxu0 %vm283_vm2, %v2437_v25  ;;  %v2714_v61 = vld [vmem:[%s4232_s25 + $0x36] sm:$0xff] }
 0x107   : > { %3656 = vmatprep.mubr.msk.bf16.mxu1 %vm283_vm2, %v4610_v9  ;;  %3824 = vmatprep.mubr.msk.bf16.mxu0 %vm283_vm2, %v2438_v26  ;;  %v2715_v9 = vld [vmem:[%s4232_s25 + $0x3e] sm:$0xff]  ;;  %v2738_v25 = vld [vmem:[%s4232_s25 + $0xf6] sm:$0xff] }
 0x108   : > { %v2749_v35 = vpack.c.bf16 %v2715_v9, %v2714_v61  ;;  %v2739_v26 = vld [vmem:[%s4232_s25 + $0xfe] sm:$0xff]  ;;  %v1460_v61 = vpack.c.bf16 %v1441_v60, %v1440_v56  ;;  %v2762_v9 = vpack.c.bf16 %v2741_v28, %v2740_v27 }
 0x10e   : > { %3657 = vmatmul.mubr.msk.bf16.gmra.mrb[16].mxu1 %vm283_vm2, %v4612_v11  ;;  %3825 = vmatmul.mubr.msk.bf16.gmra.mrb[32].mxu0 %vm283_vm2, %v2439_v33  ;;  %v2718_v11 = vld [vmem:[%s4232_s25 + $0x56] sm:$0xff]  ;;  %v1459_v33 = vpack.c.bf16 %v1439_v23, %v1438_v22 }
 0x10f   : > { %3660 = vmatprep.mubr.msk.bf16.mxu1 %vm283_vm2, %v4628_v30  ;;  %3830 = vmatprep.mubr.msk.bf16.mxu0 %vm283_vm2, %v2748_v34  ;;  %v2719_v30 = vld [vmem:[%s4232_s25 + $0x5e] sm:$0xff]  ;;  %v2761_v34 = vpack.c.bf16 %v2739_v26, %v2738_v25 }
 0x110   : > { %v2751_v24 = vpack.c.bf16 %v2719_v30, %v2718_v11  ;;  %v2744_v11 = vld [vmem:[%s4232_s25 + $0x126] sm:$0xff]  ;;  %v2745_v30 = vld [vmem:[%s4232_s25 + $0x12e] sm:$0xff] }
 0x116   : > { %3661 = vmatmul.mubr.msk.bf16.gmra.mrb[20].mxu1 %vm283_vm2, %v4630_v5  ;;  %3831 = vmatmul.mubr.msk.bf16.vlgmr.msra.gmra.mrb[0].mxu0 %vm283_vm2, %v2749_v35  ;;  %v2722_v5 = vld [vmem:[%s4232_s25 + $0x76] sm:$0xff] }
 0x117   : > { %3664 = vmatprep.mubr.msk.bf16.mxu1 %vm283_vm2, %v4647_v45  ;;  %3834 = vmatprep.mubr.msk.bf16.mxu0 %vm283_vm2, %v2750_v37  ;;  %v2723_v45 = vld [vmem:[%s4232_s25 + $0x7e] sm:$0xff]  ;;  %v2742_v35 = vld [vmem:[%s4232_s25 + $0x116] sm:$0xff] }
 0x118   : > { %v2753_v42 = vpack.c.bf16 %v2723_v45, %v2722_v5  ;;  %v2743_v37 = vld [vmem:[%s4232_s25 + $0x11e] sm:$0xff] }
 0x119   : > { %v2763_v39 = vpack.c.bf16 %v2743_v37, %v2742_v35  ;;  %v2747_v5 = vld [vmem:[%s4232_s25 + $0x13e] sm:$0xff] }
 0x11e   : > { %3665 = vmatmul.mubr.msk.bf16.gmra.mrb[24].mxu1 %vm283_vm2, %v4649_v55  ;;  %3835 = vmatmul.mubr.msk.bf16.gmra.mrb[4].mxu0 %vm283_vm2, %v2751_v24  ;;  %v1116_v55 = vld [vmem:[%s4232_s25 + $0x122] sm:$0xff]  ;;  %v2764_v24 = vpack.c.bf16 %v2745_v30, %v2744_v11 }
 0x11f   : > { %3668 = vmatprep.mubr.msk.bf16.mxu1 %vm283_vm2, %v4665_v18  ;;  %3838 = vmatprep.mubr.msk.bf16.mxu0 %vm283_vm2, %v2752_v40  ;;  %v2727_v18 = vld [vmem:[%s4232_s25 + $0x9e] sm:$0xff]  ;;  %v1135_v52 = vpack.c.bf16 %v1117_v43, %v1116_v55  ;;  %v2746_v40 = vld [vmem:[%s4232_s25 + $0x136] sm:$0xff] }
 0x120   : > { %v2755_v53 = vpack.c.bf16 %v2727_v18, %v2726_v6  ;;  %v2765_v45 = vpack.c.bf16 %v2747_v5, %v2746_v40 }
 0x126   : > { %3669 = vmatmul.mubr.msk.bf16.gmra.mrb[28].mxu1 %vm283_vm2, %v4667_v49  ;;  %3839 = vmatmul.mubr.msk.bf16.gmra.mrb[8].mxu0 %vm283_vm2, %v2753_v42  ;;  %v2728_v49 = vld [vmem:[%s4232_s25 + $0xa6] sm:$0xff] }
 0x127   : > { %3672 = vmatprep.mubr.msk.bf16.mxu1 %vm283_vm2, %v4681_v59  ;;  %3842 = vmatprep.mubr.msk.bf16.mxu0 %vm283_vm2, %v2754_v3  ;;  %v2756_v48 = vpack.c.bf16 %v2729_v36, %v2728_v49  ;;  %v1431_v59 = vld [vmem:[%s4232_s25 + $0xcb] sm:$0xff] }
 0x128   : > { %v1455_v8 = vpack.c.bf16 %v1431_v59, %v1430_v58 }
 0x12e   : > { %3673 = vmatmul.mubr.msk.bf16.gmra.mrb[32].mxu1 %vm283_vm2, %v1135_v52  ;;  %3843 = vmatmul.mubr.msk.bf16.gmra.mrb[12].mxu0 %vm283_vm2, %v2755_v53 }
 0x12f   : > { %3698 = vmatprep.mubr.msk.bf16.mxu1 %vm283_vm2, %v1454_v38  ;;  %3846 = vmatprep.mubr.msk.bf16.mxu0 %vm283_vm2, %v2756_v48 }
 0x136   : > { %3699 = vmatmul.mubr.msk.bf16.vlgmr.msra.gmra.mrb[20].mxu1 %vm283_vm2, %v1455_v8  ;;  %3847 = vmatmul.mubr.msk.bf16.gmra.mrb[16].mxu0 %vm283_vm2, %v2757_v0 }
 0x137   : > { %3702 = vmatprep.mubr.msk.bf16.mxu1 %vm283_vm2, %v1456_v29  ;;  %3850 = vmatprep.mubr.msk.bf16.mxu0 %vm283_vm2, %v2758_v10 }
 0x13e   : > { %3703 = vmatmul.mubr.msk.bf16.gmra.mrb[24].mxu1 %vm283_vm2, %v1457_v17  ;;  %3851 = vmatmul.mubr.msk.bf16.gmra.mrb[20].mxu0 %vm283_vm2, %v2759_v19 }
 0x13f   : > { %3706 = vmatprep.mubr.msk.bf16.mxu1 %vm283_vm2, %v1458_v20  ;;  %3854 = vmatprep.mubr.msk.bf16.mxu0 %vm283_vm2, %v2760_v54 }
 0x146   : > { %3707 = vmatmul.mubr.msk.bf16.gmra.mrb[28].mxu1 %vm283_vm2, %v1459_v33  ;;  %3855 = vmatmul.mubr.msk.bf16.gmra.mrb[24].mxu0 %vm283_vm2, %v2761_v34 }
 0x147   : > { %3710 = vmatprep.mubr.msk.bf16.mxu1 %vm283_vm2, %v1460_v61  ;;  %3858 = vmatprep.mubr.msk.bf16.mxu0 %vm283_vm2, %v2762_v9 }
 0x14e   : > { %3711 = vmatmul.mubr.msk.bf16.gmra.mrb[32].mxu1 %vm283_vm2, %v1461_v32  ;;  %3859 = vmatmul.mubr.msk.bf16.gmra.mrb[28].mxu0 %vm283_vm2, %v2763_v39 }
 0x14f   : > { %3862 = vmatprep.mubr.msk.bf16.mxu0 %vm283_vm2, %v2764_v24 }
 0x156   : > { %3863 = vmatmul.mubr.msk.bf16.gmra.mrb[32].mxu0 %vm283_vm2, %v2765_v45 }
 0x1c1   : > { %v3642_v41 = vpop.f32.mrb[0].mxu1 }
 0x1c2   : > { %v1229_v57 = vpop.f32.mrb[1].mxu1 }
 0x1c3   : > { %v3643_v42 = vpop.f32.mrb[2].mxu1 }
 0x1c4   : > { %v1232_v3 = vpop.f32.mrb[3].mxu1 }
 0x1c9   : > { %v3646_v55 = vpop.f32.mrb[4].mxu1 }
 0x1ca   : > { %v1245_v43 = vpop.f32.mrb[5].mxu1 }
 0x1cb   : > { %v3647_v6 = vpop.f32.mrb[6].mxu1 }
 0x1cc   : > { %v1248_v18 = vpop.f32.mrb[7].mxu1 }
 0x1d1   : > { %v3650_v47 = vpop.f32.mrb[8].mxu1 }
 0x1d2   : > { %v1261_v21 = vpop.f32.mrb[9].mxu1 }
 0x1d3   : > { %v3651_v49 = vpop.f32.mrb[10].mxu1 }
 0x1d4   : > { %v1264_v36 = vpop.f32.mrb[11].mxu1 }
 0x1d9   : > { %v3654_v52 = vpop.f32.mrb[12].mxu1 }
 0x1da   : > { %v1277_v53 = vpop.f32.mrb[13].mxu1 }
 0x1db   : > { %v4830_v38 = vpop.f32.mrb[14].mxu1 }
 0x1dc   : > { %v4832_v48 = vpop.f32.mrb[15].mxu1 }
 0x1e1   : > { %v4834_v58 = vpop.f32.mrb[16].mxu1 }
 0x1e2   : > { %v4836_v59 = vpop.f32.mrb[17].mxu1 }
 0x1e3   : > { %v4838_v50 = vpop.f32.mrb[18].mxu1 }
 0x1e4   : > { %v4840_v63 = vpop.f32.mrb[19].mxu1 }
 0x1e9   : > { %v3832_v62 = vpop.f32.mrb[0].mxu0 }
 0x1ea   : > { %v3868_v2 = vadd.f32 %v3832_v62, %v3642_v41  ;;  %v2859_v4 = vpop.f32.mrb[1].mxu0 }
 0x1eb   : > { %v3869_v8 = vadd.f32 %v2859_v4, %v1229_v57  ;;  %v3833_v0 = vpop.f32.mrb[2].mxu0 }
 0x1ec   : > { %v3047_v29 = vadd.f32 %v3868_v2, %v4846_v1  ;;  %v3870_v10 = vadd.f32 %v3833_v0, %v3643_v42  ;;  %v2862_v13 = vpop.f32.mrb[3].mxu0 }
 0x1ed   : > { %v3045_v12 = vadd.f32 %v3869_v8, %v4846_v1  ;;  %v3871_v14 = vadd.f32 %v2862_v13, %v1232_v3 }
 0x1ee   : > { %3084 = vst.msk [vmem:[%s4851_s16 + $0x10] sm:$0xff] %vm3081_vm3, %v3047_v29  ;;  %v3048_v15 = vadd.f32 %v3870_v10, %v4846_v1 }
 0x1ef   : > { %3082 = vst.msk [vmem:[%s4851_s16] sm:$0xff] %vm3081_vm3, %v3045_v12  ;;  %v3046_v7 = vadd.f32 %v3871_v14, %v4846_v1 }
 0x1f0   : > { %3085 = vst.msk [vmem:[%s4851_s16 + $0x18] sm:$0xff] %vm3081_vm3, %v3048_v15 }
 0x1f1   : > { %3083 = vst.msk [vmem:[%s4851_s16 + $0x8] sm:$0xff] %vm3081_vm3, %v3046_v7  ;;  %v3836_v46 = vpop.f32.mrb[4].mxu0 }
 0x1f2   : > { %v3872_v51 = vadd.f32 %v3836_v46, %v3646_v55  ;;  %v2875_v16 = vpop.f32.mrb[5].mxu0 }
 0x1f3   : > { %v3873_v17 = vadd.f32 %v2875_v16, %v1245_v43  ;;  %v3837_v19 = vpop.f32.mrb[6].mxu0 }
 0x1f4   : > { %v3051_v20 = vadd.f32 %v3872_v51, %v4846_v1  ;;  %v3874_v54 = vadd.f32 %v3837_v19, %v3647_v6  ;;  %v2878_v22 = vpop.f32.mrb[7].mxu0 }
 0x1f5   : > { %v3049_v23 = vadd.f32 %v3873_v17, %v4846_v1  ;;  %v3875_v25 = vadd.f32 %v2878_v22, %v1248_v18 }
 0x1f6   : > { %3088 = vst.msk [vmem:[%s4851_s16 + $0x30] sm:$0xff] %vm3081_vm3, %v3051_v20  ;;  %v3052_v26 = vadd.f32 %v3874_v54, %v4846_v1 }
 0x1f7   : > { %3086 = vst.msk [vmem:[%s4851_s16 + $0x20] sm:$0xff] %vm3081_vm3, %v3049_v23  ;;  %v3050_v56 = vadd.f32 %v3875_v25, %v4846_v1 }
 0x1f8   : > { %3089 = vst.msk [vmem:[%s4851_s16 + $0x38] sm:$0xff] %vm3081_vm3, %v3052_v26 }
 0x1f9   : > { %3087 = vst.msk [vmem:[%s4851_s16 + $0x28] sm:$0xff] %vm3081_vm3, %v3050_v56  ;;  %v3840_v60 = vpop.f32.mrb[8].mxu0 }
 0x1fa   : > { %v3876_v27 = vadd.f32 %v3840_v60, %v3650_v47  ;;  %v2891_v28 = vpop.f32.mrb[9].mxu0 }
 0x1fb   : > { %v3877_v33 = vadd.f32 %v2891_v28, %v1261_v21  ;;  %v3841_v34 = vpop.f32.mrb[10].mxu0 }
 0x1fc   : > { %v3055_v61 = vadd.f32 %v3876_v27, %v4846_v1  ;;  %v3878_v9 = vadd.f32 %v3841_v34, %v3651_v49  ;;  %v2894_v44 = vpop.f32.mrb[11].mxu0 }
 0x1fd   : > { %v3053_v31 = vadd.f32 %v3877_v33, %v4846_v1  ;;  %v3879_v35 = vadd.f32 %v2894_v44, %v1264_v36 }
 0x1fe   : > { %3092 = vst.msk [vmem:[%s4851_s16 + $0x50] sm:$0xff] %vm3081_vm3, %v3055_v61  ;;  %v3056_v37 = vadd.f32 %v3878_v9, %v4846_v1 }
 0x1ff   : > { %3090 = vst.msk [vmem:[%s4851_s16 + $0x40] sm:$0xff] %vm3081_vm3, %v3053_v31  ;;  %v3054_v11 = vadd.f32 %v3879_v35, %v4846_v1 }
 0x200   : > { %3093 = vst.msk [vmem:[%s4851_s16 + $0x58] sm:$0xff] %vm3081_vm3, %v3056_v37 }
 0x201   : > { %3091 = vst.msk [vmem:[%s4851_s16 + $0x48] sm:$0xff] %vm3081_vm3, %v3054_v11  ;;  %v3844_v30 = vpop.f32.mrb[12].mxu0 }
 0x202   : > { %v3880_v32 = vadd.f32 %v3844_v30, %v3654_v52  ;;  %v2907_v39 = vpop.f32.mrb[13].mxu0 }
 0x203   : > { %v3881_v24 = vadd.f32 %v2907_v39, %v1277_v53  ;;  %v3845_v40 = vpop.f32.mrb[14].mxu0 }
 0x204   : > { %v3059_v5 = vadd.f32 %v3880_v32, %v4846_v1  ;;  %v3882_v45 = vadd.f32 %v3845_v40, %v4830_v38  ;;  %v2910_v41 = vpop.f32.mrb[15].mxu0 }
 0x205   : > { %v3057_v57 = vadd.f32 %v3881_v24, %v4846_v1  ;;  %v3883_v42 = vadd.f32 %v2910_v41, %v4832_v48 }
 0x206   : > { %3096 = vst.msk [vmem:[%s4851_s16 + $0x70] sm:$0xff] %vm3081_vm3, %v3059_v5  ;;  %v3060_v3 = vadd.f32 %v3882_v45, %v4846_v1 }
 0x207   : > { %3094 = vst.msk [vmem:[%s4851_s16 + $0x60] sm:$0xff] %vm3081_vm3, %v3057_v57  ;;  %v3058_v55 = vadd.f32 %v3883_v42, %v4846_v1 }
 0x208   : > { %3097 = vst.msk [vmem:[%s4851_s16 + $0x78] sm:$0xff] %vm3081_vm3, %v3060_v3 }
 0x209   : > { %v3700_v43 = vpop.f32.mrb[20].mxu1  ;;  %3095 = vst.msk [vmem:[%s4851_s16 + $0x68] sm:$0xff] %vm3081_vm3, %v3058_v55  ;;  %v3848_v6 = vpop.f32.mrb[16].mxu0 }
 0x20a   : > { %v1635_v18 = vpop.f32.mrb[21].mxu1  ;;  %v3884_v47 = vadd.f32 %v3848_v6, %v4834_v58  ;;  %v2923_v21 = vpop.f32.mrb[17].mxu0 }
 0x20b   : > { %v3701_v49 = vpop.f32.mrb[22].mxu1  ;;  %v3885_v36 = vadd.f32 %v2923_v21, %v4836_v59  ;;  %v3849_v52 = vpop.f32.mrb[18].mxu0 }
 0x20c   : > { %v1638_v53 = vpop.f32.mrb[23].mxu1  ;;  %v3063_v38 = vadd.f32 %v3884_v47, %v4846_v1  ;;  %v3886_v48 = vadd.f32 %v3849_v52, %v4838_v50  ;;  %v2926_v62 = vpop.f32.mrb[19].mxu0 }
 0x20d   : > { %v3061_v2 = vadd.f32 %v3885_v36, %v4846_v1  ;;  %v3887_v4 = vadd.f32 %v2926_v62, %v4840_v63 }
 0x20e   : > { %3100 = vst.msk [vmem:[%s4851_s16 + $0x90] sm:$0xff] %vm3081_vm3, %v3063_v38  ;;  %v3064_v58 = vadd.f32 %v3886_v48, %v4846_v1 }
 0x20f   : > { %3098 = vst.msk [vmem:[%s4851_s16 + $0x80] sm:$0xff] %vm3081_vm3, %v3061_v2  ;;  %v3062_v8 = vadd.f32 %v3887_v4, %v4846_v1 }
 0x210   : > { %3101 = vst.msk [vmem:[%s4851_s16 + $0x98] sm:$0xff] %vm3081_vm3, %v3064_v58 }
 0x211   : > { %v3704_v59 = vpop.f32.mrb[24].mxu1  ;;  %3099 = vst.msk [vmem:[%s4851_s16 + $0x88] sm:$0xff] %vm3081_vm3, %v3062_v8  ;;  %v3852_v50 = vpop.f32.mrb[20].mxu0 }
 0x212   : > { %v1651_v0 = vpop.f32.mrb[25].mxu1  ;;  %v3888_v29 = vadd.f32 %v3852_v50, %v3700_v43  ;;  %v2939_v63 = vpop.f32.mrb[21].mxu0 }
 0x213   : > { %v3705_v10 = vpop.f32.mrb[26].mxu1  ;;  %v3889_v13 = vadd.f32 %v2939_v63, %v1635_v18  ;;  %v3853_v12 = vpop.f32.mrb[22].mxu0 }
 0x214   : > { %v1654_v14 = vpop.f32.mrb[27].mxu1  ;;  %v3067_v15 = vadd.f32 %v3888_v29, %v4846_v1  ;;  %v3890_v7 = vadd.f32 %v3853_v12, %v3701_v49  ;;  %v2942_v46 = vpop.f32.mrb[23].mxu0 }
 0x215   : > { %v3065_v51 = vadd.f32 %v3889_v13, %v4846_v1  ;;  %v3891_v16 = vadd.f32 %v2942_v46, %v1638_v53 }
 0x216   : > { %3104 = vst.msk [vmem:[%s4851_s16 + $0xb0] sm:$0xff] %vm3081_vm3, %v3067_v15  ;;  %v3068_v17 = vadd.f32 %v3890_v7, %v4846_v1 }
 0x217   : > { %3102 = vst.msk [vmem:[%s4851_s16 + $0xa0] sm:$0xff] %vm3081_vm3, %v3065_v51  ;;  %v3066_v19 = vadd.f32 %v3891_v16, %v4846_v1 }
 0x218   : > { %3105 = vst.msk [vmem:[%s4851_s16 + $0xb8] sm:$0xff] %vm3081_vm3, %v3068_v17 }
 0x219   : > { %v3708_v20 = vpop.f32.mrb[28].mxu1  ;;  %3103 = vst.msk [vmem:[%s4851_s16 + $0xa8] sm:$0xff] %vm3081_vm3, %v3066_v19  ;;  %v3856_v54 = vpop.f32.mrb[24].mxu0 }
 0x21a   : > { %v1667_v22 = vpop.f32.mrb[29].mxu1  ;;  %v3892_v23 = vadd.f32 %v3856_v54, %v3704_v59  ;;  %v2955_v25 = vpop.f32.mrb[25].mxu0 }
 0x21b   : > { %v3709_v26 = vpop.f32.mrb[30].mxu1  ;;  %v3893_v56 = vadd.f32 %v2955_v25, %v1651_v0  ;;  %v3857_v60 = vpop.f32.mrb[26].mxu0 }
 0x21c   : > { %v1670_v27 = vpop.f32.mrb[31].mxu1  ;;  %v3071_v28 = vadd.f32 %v3892_v23, %v4846_v1  ;;  %v3894_v33 = vadd.f32 %v3857_v60, %v3705_v10  ;;  %v2958_v34 = vpop.f32.mrb[27].mxu0 }
 0x21d   : > { %v3069_v61 = vadd.f32 %v3893_v56, %v4846_v1  ;;  %v3895_v9 = vadd.f32 %v2958_v34, %v1654_v14 }
 0x21e   : > { %3108 = vst.msk [vmem:[%s4851_s16 + $0xd0] sm:$0xff] %vm3081_vm3, %v3071_v28  ;;  %v3072_v44 = vadd.f32 %v3894_v33, %v4846_v1 }
 0x21f   : > { %3106 = vst.msk [vmem:[%s4851_s16 + $0xc0] sm:$0xff] %vm3081_vm3, %v3069_v61  ;;  %v3070_v31 = vadd.f32 %v3895_v9, %v4846_v1 }
 0x220   : > { %3109 = vst.msk [vmem:[%s4851_s16 + $0xd8] sm:$0xff] %vm3081_vm3, %v3072_v44 }
 0x221   : > { %v3712_v35 = vpop.f32.mrb[32].mxu1  ;;  %3107 = vst.msk [vmem:[%s4851_s16 + $0xc8] sm:$0xff] %vm3081_vm3, %v3070_v31  ;;  %v3860_v37 = vpop.f32.mrb[28].mxu0 }
 0x222   : > { %v1683_v11 = vpop.f32.mrb[33].mxu1  ;;  %v3896_v30 = vadd.f32 %v3860_v37, %v3708_v20  ;;  %v2971_v32 = vpop.f32.mrb[29].mxu0 }
 0x223   : > { %v3713_v39 = vpop.f32.mrb[34].mxu1  ;;  %v3897_v24 = vadd.f32 %v2971_v32, %v1667_v22  ;;  %v3861_v40 = vpop.f32.mrb[30].mxu0 }
 0x224   : > { %v1686_v5 = vpop.f32.mrb[35].mxu1  ;;  %v3075_v45 = vadd.f32 %v3896_v30, %v4846_v1  ;;  %v3898_v41 = vadd.f32 %v3861_v40, %v3709_v26  ;;  %v2974_v57 = vpop.f32.mrb[31].mxu0 }
 0x225   : > { %v3073_v42 = vadd.f32 %v3897_v24, %v4846_v1  ;;  %v3899_v3 = vadd.f32 %v2974_v57, %v1670_v27 }
 0x226   : > { %3112 = vst.msk [vmem:[%s4851_s16 + $0xf0] sm:$0xff] %vm3081_vm3, %v3075_v45  ;;  %v3076_v55 = vadd.f32 %v3898_v41, %v4846_v1 }
 0x227   : > { %3110 = vst.msk [vmem:[%s4851_s16 + $0xe0] sm:$0xff] %vm3081_vm3, %v3073_v42  ;;  %v3074_v43 = vadd.f32 %v3899_v3, %v4846_v1 }
 0x228   : > { %3113 = vst.msk [vmem:[%s4851_s16 + $0xf8] sm:$0xff] %vm3081_vm3, %v3076_v55 }
 0x229   : > { %3111 = vst.msk [vmem:[%s4851_s16 + $0xe8] sm:$0xff] %vm3081_vm3, %v3074_v43  ;;  %v3864_v6 = vpop.f32.mrb[32].mxu0 }
 0x22a   : > { %v3900_v18 = vadd.f32 %v3864_v6, %v3712_v35  ;;  %v2987_v47 = vpop.f32.mrb[33].mxu0 }
 0x22b   : > { %v3901_v21 = vadd.f32 %v2987_v47, %v1683_v11  ;;  %v3865_v49 = vpop.f32.mrb[34].mxu0 }
 0x22c   : > { %v3079_v36 = vadd.f32 %v3900_v18, %v4846_v1  ;;  %v3902_v52 = vadd.f32 %v3865_v49, %v3713_v39  ;;  %v2990_v53 = vpop.f32.mrb[35].mxu0 }
 0x22d   : > { %v3077_v38 = vadd.f32 %v3901_v21, %v4846_v1  ;;  %v3903_v48 = vadd.f32 %v2990_v53, %v1686_v5 }
 0x22e   : > { %3116 = vst.msk [vmem:[%s4851_s16 + $0x110] sm:$0xff] %vm3081_vm3, %v3079_v36  ;;  %v3080_v62 = vadd.f32 %v3902_v52, %v4846_v1 }
 0x22f   : > { %3114 = vst.msk [vmem:[%s4851_s16 + $0x100] sm:$0xff] %vm3081_vm3, %v3077_v38  ;;  %v3078_v2 = vadd.f32 %v3903_v48, %v4846_v1 }
 0x230   : > { %3117 = vst.msk [vmem:[%s4851_s16 + $0x118] sm:$0xff] %vm3081_vm3, %v3080_v62 }
 0x231   : > { %3115 = vst.msk [vmem:[%s4851_s16 + $0x108] sm:$0xff] %vm3081_vm3, %v3078_v2 }
 0x232 PF: > { %s13_s12 = sadd.s32 1, %s4173_s12  }
 0x233   : > { %p10_p4 = scmp.ge.s32.totalorder %s13_s12, 4  }
 0x235   :  { %12 = sbr.rel (!%p10_p4) target bundleno = 1 (0x1), region = 70 }

</bundles_post_ra>
